<compile_context>
chip_gen: v7x
topology: tpu7x:2x2x1
jax: 0.10.0
libtpu: 0.0.40
codegen_flags: <defaults>
</compile_context>

<pallas_src>
import functools

import numpy as np
import jax
import jax.numpy as jnp
from jax import lax
from jax.experimental import pallas as pl
from jax.experimental.pallas import tpu as pltpu


def _round_up(x, m):
    return ((x + m - 1) // m) * m


def cnn_kernel(ids_ref, table_ref, wpack_ref, bpack_ref, mask_ref,
               wfc_ref, bfc_ref, out_ref):
    """One batch tile (TB rows) per grid step.

    ids_ref   : (fs_max, TB*S, 1) int32   shifted token ids ("im2col on ids")
    table_ref : (V, E)            f32     embedding table (resident in VMEM)
    wpack_ref : (fs_max, E, NFP)  f32     packed conv weights (3 branches, padded)
    bpack_ref : (1, NFP)          f32     packed conv biases
    mask_ref  : (S, NFP)          f32     1.0 where the conv position is valid
    wfc_ref   : (NFP, OUTP)       f32     padded FC weight
    bfc_ref   : (1, OUTP)         f32     padded FC bias
    out_ref   : (TB, OUTP)        f32     sigmoid(logits) (lane-dense block)
    """
    fs_max = ids_ref.shape[0]
    M = ids_ref.shape[1]                       # M = TB * S (batch folded into M)
    V, _ = table_ref.shape
    S, NFP = mask_ref.shape
    TB = M // S

    table = table_ref[...]                     # hoisted out of the k loop

    def shifted_conv(k):
        # Fused embedding lookup for time-shift k: one-hot (M, V) @ (V, E).
        # TODO(synk): for a production-size vocab use an in-kernel gather
        # (jnp.take on the VMEM table) or a DMA gather instead of one-hot.
        ids_k = ids_ref[k]                                           # (M, 1)
        vocab = lax.broadcasted_iota(jnp.int32, (M, V), 1)
        onehot = (vocab == ids_k).astype(jnp.float32)                # (M, V)
        emb_k = jnp.dot(onehot, table,
                        preferred_element_type=jnp.float32)          # (M, E)
        # All three filter banks at once (lane-dense N = NFP).
        return jnp.dot(emb_k, wpack_ref[k],
                       preferred_element_type=jnp.float32)           # (M, NFP)

    acc = shifted_conv(0)                      # init with k=0 (no zeros+add)
    for k in range(1, fs_max):
        acc = acc + shifted_conv(k)

    # bias + ReLU, then zero out conv positions that are out of range for the
    # channel's filter size (safe: ReLU output >= 0, so 0 never wins the max).
    conv = jnp.maximum(acc + bpack_ref[...], 0.0)                    # (M, NFP)
    conv = conv.reshape(TB, S, NFP) * mask_ref[...][None, :, :]
    pooled = jnp.max(conv, axis=1)                                   # (TB, NFP)

    # Single batched FC + sigmoid; lane-dense (TB, OUTP) store.
    logits = jnp.dot(pooled, wfc_ref[...],
                     preferred_element_type=jnp.float32) + bfc_ref[...]
    # TODO(synk): dropout is treated as identity (inference / eval mode).
    out_ref[...] = jax.nn.sigmoid(logits)


@functools.partial(jax.jit, static_argnames=("pad_idx", "block_b"))
def cnn_forward(text, emb_table, w0, b0, w1, b1, w2, b2, wfc, bfc,
                *, pad_idx=0, block_b=128):
    B, S = text.shape
    V, E = emb_table.shape
    NF = w0.shape[2]
    OUT = wfc.shape[1]
    fs_sizes = (w0.shape[0], w1.shape[0], w2.shape[0])
    fs_max = max(fs_sizes)
    assert S >= fs_max, "sequence must be at least as long as the largest filter"

    NFC = 3 * NF
    NFP = _round_up(max(NFC, 128), 128)        # lane-dense conv-channel dim
    OUTP = _round_up(max(OUT, 128), 128)       # lane-dense output dim

    # ---- batch / sequence padding so every tile is (8, 128)-friendly --------
    Sp = _round_up(S, 8)
    TB = _round_up(min(block_b, _round_up(B, 8)), 8)
    Bp = _round_up(B, TB)
    text_p = jnp.pad(text.astype(jnp.int32), ((0, Bp - B), (0, Sp - S)),
                     constant_values=pad_idx)

    # ---- "im2col" on the token ids: ids_shift[k, b*Sp + t] = text[b, t + k] --
    text_wide = jnp.pad(text_p, ((0, 0), (0, fs_max - 1)),
                        constant_values=pad_idx)
    ids_shift = jnp.stack([text_wide[:, k:k + Sp] for k in range(fs_max)],
                          axis=0)                                    # (fs, Bp, Sp)
    ids_shift = ids_shift.reshape(fs_max, Bp * Sp, 1)

    # ---- pack the three filter banks into one lane-dense weight -------------
    w_pack = jnp.zeros((fs_max, E, NFP), jnp.float32)
    b_pack = jnp.zeros((1, NFP), jnp.float32)
    for i, (w, bias) in enumerate(((w0, b0), (w1, b1), (w2, b2))):
        fs = w.shape[0]
        w_pack = w_pack.at[:fs, :, i * NF:(i + 1) * NF].set(w.astype(jnp.float32))
        b_pack = b_pack.at[0, i * NF:(i + 1) * NF].set(
            jnp.reshape(bias, (-1,)).astype(jnp.float32))

    # ---- FC weight / bias padded to lane-dense shapes ------------------------
    wfc_p = jnp.zeros((NFP, OUTP), jnp.float32).at[:NFC, :OUT].set(
        wfc.astype(jnp.float32))
    bfc_p = jnp.zeros((1, OUTP), jnp.float32).at[0, :OUT].set(
        jnp.reshape(bfc, (-1,)).astype(jnp.float32))

    # ---- per-channel valid-position mask (max-pool only over t <= S - fs) ---
    fs_per_chan = np.full((NFP,), fs_max, np.int32)
    for i, fs in enumerate(fs_sizes):
        fs_per_chan[i * NF:(i + 1) * NF] = fs
    mask = (np.arange(Sp)[:, None] <= (S - fs_per_chan)[None, :]).astype(np.float32)
    mask = jnp.asarray(mask)                                          # (Sp, NFP)

    grid = (Bp // TB,)
    M = TB * Sp

    out = pl.pallas_call(
        cnn_kernel,
        out_shape=jax.ShapeDtypeStruct((Bp, OUTP), jnp.float32),
        grid_spec=pltpu.PrefetchScalarGridSpec(
            num_scalar_prefetch=0,
            grid=grid,
            in_specs=[
                pl.BlockSpec((fs_max, M, 1), lambda b: (0, b, 0)),     # ids
                pl.BlockSpec((V, E), lambda b: (0, 0)),                # table
                pl.BlockSpec((fs_max, E, NFP), lambda b: (0, 0, 0)),   # w_pack
                pl.BlockSpec((1, NFP), lambda b: (0, 0)),              # b_pack
                pl.BlockSpec((Sp, NFP), lambda b: (0, 0)),             # mask
                pl.BlockSpec((NFP, OUTP), lambda b: (0, 0)),           # wfc
                pl.BlockSpec((1, OUTP), lambda b: (0, 0)),             # bfc
            ],
            out_specs=pl.BlockSpec((TB, OUTP), lambda b: (b, 0)),
        ),
        compiler_params=pltpu.CompilerParams(
            dimension_semantics=("parallel",)),
    )(ids_shift, emb_table.astype(jnp.float32), w_pack, b_pack, mask,
      wfc_p, bfc_p)

    return out[:B, :OUT]                                              # (B, OUT)


def reference_forward(text, emb_table, w0, b0, w1, b1, w2, b2, wfc, bfc):
    """Pure-JAX reference mirroring the PyTorch forward (eval mode)."""
    emb = emb_table[text].astype(jnp.float32)                         # (B, S, E)
    B, S, E = emb.shape
    pooled = []
    for w, b in ((w0, b0), (w1, b1), (w2, b2)):
        fs = w.shape[0]
        L = S - fs + 1
        conv = jnp.zeros((B, L, w.shape[2]), jnp.float32)
        for k in range(fs):
            conv = conv + jnp.einsum("ble,ef->blf", emb[:, k:k + L, :], w[k])
        conv = jax.nn.relu(conv + b.reshape(1, 1, -1))
        pooled.append(jnp.max(conv, axis=1))                          # (B, NF)
    cat = jnp.concatenate(pooled, axis=1)                             # (B, 3*NF)
    return jax.nn.sigmoid(cat @ wfc + bfc.reshape(1, -1))


if __name__ == "__main__":
    # Small, deterministic configuration consistent with the module.
    VOCAB, EMB_DIM, N_FILTERS = 50, 32, 8
    FILTER_SIZES = (3, 4, 5)
    OUTPUT_DIM = 1
    PAD_IDX = 0
    BATCH, SEQ = 16, 16          # 2 batch tiles of 8 -> 2 "parallel" grid steps

    key = jax.random.PRNGKey(0)
    ks = jax.random.split(key, 10)

    emb_table = 0.1 * jax.random.normal(ks[0], (VOCAB, EMB_DIM), jnp.float32)
    emb_table = emb_table.at[PAD_IDX].set(0.0)         # padding_idx row zeroed

    def conv_params(k, fs):
        kw, kb = jax.random.split(k)
        w = 0.1 * jax.random.normal(kw, (fs, EMB_DIM, N_FILTERS), jnp.float32)
        b = 0.1 * jax.random.normal(kb, (1, N_FILTERS), jnp.float32)
        return w, b

    w0, b0 = conv_params(ks[1], FILTER_SIZES[0])
    w1, b1 = conv_params(ks[2], FILTER_SIZES[1])
    w2, b2 = conv_params(ks[3], FILTER_SIZES[2])

    wfc = 0.1 * jax.random.normal(
        ks[4], (len(FILTER_SIZES) * N_FILTERS, OUTPUT_DIM), jnp.float32)
    bfc = 0.1 * jax.random.normal(ks[5], (1, OUTPUT_DIM), jnp.float32)

    text = jax.random.randint(ks[6], (BATCH, SEQ), 0, VOCAB, jnp.int32)

    out = cnn_forward(text, emb_table, w0, b0, w1, b1, w2, b2, wfc, bfc,
                      pad_idx=PAD_IDX, block_b=8)
    out = jax.block_until_ready(out)

    ref = reference_forward(text, emb_table, w0, b0, w1, b1, w2, b2, wfc, bfc)
    assert out.shape == (BATCH, OUTPUT_DIM)
    assert jnp.allclose(out, ref, rtol=1e-3, atol=1e-3), (out, ref)

    print("KERNEL_OK")
</pallas_src>

<mosaic_0001>
module attributes {stable_mosaic.version = 11 : i64} {
  func.func @cnn_kernel(%arg0: i32, %arg1: memref<5x128x1xi32, #tpu.memory_space<vmem>>, %arg2: memref<50x32xf32, #tpu.memory_space<vmem>>, %arg3: memref<5x32x128xf32, #tpu.memory_space<vmem>>, %arg4: memref<1x128xf32, #tpu.memory_space<vmem>>, %arg5: memref<16x128xf32, #tpu.memory_space<vmem>>, %arg6: memref<128x128xf32, #tpu.memory_space<vmem>>, %arg7: memref<1x128xf32, #tpu.memory_space<vmem>>, %arg8: memref<8x128xf32, #tpu.memory_space<vmem>>) attributes {dimension_semantics = [#tpu.dimension_semantics<parallel>], iteration_bounds = array<i64: 2>, scalar_prefetch = 0 : i64, scratch_operands = 0 : i64, tpu.core_type = #tpu.core_type<tc>, window_params = [{transform_indices = @transform_0, window_bounds = array<i64: 5, 128, 1>}, {pipeline_mode = #tpu.pipeline_mode<synchronous>, transform_indices = @transform_1, window_bounds = array<i64: 50, 32>}, {pipeline_mode = #tpu.pipeline_mode<synchronous>, transform_indices = @transform_2, window_bounds = array<i64: 5, 32, 128>}, {pipeline_mode = #tpu.pipeline_mode<synchronous>, transform_indices = @transform_3, window_bounds = array<i64: 1, 128>}, {pipeline_mode = #tpu.pipeline_mode<synchronous>, transform_indices = @transform_4, window_bounds = array<i64: 16, 128>}, {pipeline_mode = #tpu.pipeline_mode<synchronous>, transform_indices = @transform_5, window_bounds = array<i64: 128, 128>}, {pipeline_mode = #tpu.pipeline_mode<synchronous>, transform_indices = @transform_6, window_bounds = array<i64: 1, 128>}, {transform_indices = @transform_7, window_bounds = array<i64: 8, 128>}]} {
    %c0 = arith.constant 0 : index
    %c0_0 = arith.constant 0 : index
    %0 = vector.load %arg2[%c0, %c0_0] : memref<50x32xf32, #tpu.memory_space<vmem>>, vector<50x32xf32>
    %c0_1 = arith.constant 0 : index
    %c0_2 = arith.constant 0 : index
    %c0_3 = arith.constant 0 : index
    %1 = vector.load %arg1[%c0_1, %c0_2, %c0_3] : memref<5x128x1xi32, #tpu.memory_space<vmem>>, vector<1x128x1xi32>
    %2 = vector.shape_cast %1 : vector<1x128x1xi32> to vector<128x1xi32>
    %3 = tpu.iota {dimensions = array<i32: 1>} : vector<128x50xi32>
    %4 = vector.broadcast %2 : vector<128x1xi32> to vector<128x50xi32>
    %5 = arith.cmpi eq, %3, %4 : vector<128x50xi32>
    %6 = arith.extui %5 : vector<128x50xi1> to vector<128x50xi32>
    %7 = arith.sitofp %6 : vector<128x50xi32> to vector<128x50xf32>
    %cst = arith.constant dense<0.000000e+00> : vector<128x32xf32>
    %8 = tpu.matmul %7, %0, %cst {dimension_numbers = #tpu.dot_dimension_numbers<[1], [0], [0], [1], [0, 0, 1, 1], [], []>} : vector<128x50xf32>, vector<50x32xf32>, vector<128x32xf32> -> vector<128x32xf32>
    %c0_4 = arith.constant 0 : index
    %c0_5 = arith.constant 0 : index
    %c0_6 = arith.constant 0 : index
    %9 = vector.load %arg3[%c0_4, %c0_5, %c0_6] : memref<5x32x128xf32, #tpu.memory_space<vmem>>, vector<1x32x128xf32>
    %10 = vector.shape_cast %9 : vector<1x32x128xf32> to vector<32x128xf32>
    %cst_7 = arith.constant dense<0.000000e+00> : vector<128x128xf32>
    %11 = tpu.matmul %8, %10, %cst_7 {dimension_numbers = #tpu.dot_dimension_numbers<[1], [0], [0], [1], [0, 0, 1, 1], [], []>} : vector<128x32xf32>, vector<32x128xf32>, vector<128x128xf32> -> vector<128x128xf32>
    %c1 = arith.constant 1 : index
    %c0_8 = arith.constant 0 : index
    %c0_9 = arith.constant 0 : index
    %12 = vector.load %arg1[%c1, %c0_8, %c0_9] : memref<5x128x1xi32, #tpu.memory_space<vmem>>, vector<1x128x1xi32>
    %13 = vector.shape_cast %12 : vector<1x128x1xi32> to vector<128x1xi32>
    %14 = tpu.iota {dimensions = array<i32: 1>} : vector<128x50xi32>
    %15 = vector.broadcast %13 : vector<128x1xi32> to vector<128x50xi32>
    %16 = arith.cmpi eq, %14, %15 : vector<128x50xi32>
    %17 = arith.extui %16 : vector<128x50xi1> to vector<128x50xi32>
    %18 = arith.sitofp %17 : vector<128x50xi32> to vector<128x50xf32>
    %cst_10 = arith.constant dense<0.000000e+00> : vector<128x32xf32>
    %19 = tpu.matmul %18, %0, %cst_10 {dimension_numbers = #tpu.dot_dimension_numbers<[1], [0], [0], [1], [0, 0, 1, 1], [], []>} : vector<128x50xf32>, vector<50x32xf32>, vector<128x32xf32> -> vector<128x32xf32>
    %c1_11 = arith.constant 1 : index
    %c0_12 = arith.constant 0 : index
    %c0_13 = arith.constant 0 : index
    %20 = vector.load %arg3[%c1_11, %c0_12, %c0_13] : memref<5x32x128xf32, #tpu.memory_space<vmem>>, vector<1x32x128xf32>
    %21 = vector.shape_cast %20 : vector<1x32x128xf32> to vector<32x128xf32>
    %cst_14 = arith.constant dense<0.000000e+00> : vector<128x128xf32>
    %22 = tpu.matmul %19, %21, %cst_14 {dimension_numbers = #tpu.dot_dimension_numbers<[1], [0], [0], [1], [0, 0, 1, 1], [], []>} : vector<128x32xf32>, vector<32x128xf32>, vector<128x128xf32> -> vector<128x128xf32>
    %23 = arith.addf %11, %22 : vector<128x128xf32>
    %c2 = arith.constant 2 : index
    %c0_15 = arith.constant 0 : index
    %c0_16 = arith.constant 0 : index
    %24 = vector.load %arg1[%c2, %c0_15, %c0_16] : memref<5x128x1xi32, #tpu.memory_space<vmem>>, vector<1x128x1xi32>
    %25 = vector.shape_cast %24 : vector<1x128x1xi32> to vector<128x1xi32>
    %26 = tpu.iota {dimensions = array<i32: 1>} : vector<128x50xi32>
    %27 = vector.broadcast %25 : vector<128x1xi32> to vector<128x50xi32>
    %28 = arith.cmpi eq, %26, %27 : vector<128x50xi32>
    %29 = arith.extui %28 : vector<128x50xi1> to vector<128x50xi32>
    %30 = arith.sitofp %29 : vector<128x50xi32> to vector<128x50xf32>
    %cst_17 = arith.constant dense<0.000000e+00> : vector<128x32xf32>
    %31 = tpu.matmul %30, %0, %cst_17 {dimension_numbers = #tpu.dot_dimension_numbers<[1], [0], [0], [1], [0, 0, 1, 1], [], []>} : vector<128x50xf32>, vector<50x32xf32>, vector<128x32xf32> -> vector<128x32xf32>
    %c2_18 = arith.constant 2 : index
    %c0_19 = arith.constant 0 : index
    %c0_20 = arith.constant 0 : index
    %32 = vector.load %arg3[%c2_18, %c0_19, %c0_20] : memref<5x32x128xf32, #tpu.memory_space<vmem>>, vector<1x32x128xf32>
    %33 = vector.shape_cast %32 : vector<1x32x128xf32> to vector<32x128xf32>
    %cst_21 = arith.constant dense<0.000000e+00> : vector<128x128xf32>
    %34 = tpu.matmul %31, %33, %cst_21 {dimension_numbers = #tpu.dot_dimension_numbers<[1], [0], [0], [1], [0, 0, 1, 1], [], []>} : vector<128x32xf32>, vector<32x128xf32>, vector<128x128xf32> -> vector<128x128xf32>
    %35 = arith.addf %23, %34 : vector<128x128xf32>
    %c3 = arith.constant 3 : index
    %c0_22 = arith.constant 0 : index
    %c0_23 = arith.constant 0 : index
    %36 = vector.load %arg1[%c3, %c0_22, %c0_23] : memref<5x128x1xi32, #tpu.memory_space<vmem>>, vector<1x128x1xi32>
    %37 = vector.shape_cast %36 : vector<1x128x1xi32> to vector<128x1xi32>
    %38 = tpu.iota {dimensions = array<i32: 1>} : vector<128x50xi32>
    %39 = vector.broadcast %37 : vector<128x1xi32> to vector<128x50xi32>
    %40 = arith.cmpi eq, %38, %39 : vector<128x50xi32>
    %41 = arith.extui %40 : vector<128x50xi1> to vector<128x50xi32>
    %42 = arith.sitofp %41 : vector<128x50xi32> to vector<128x50xf32>
    %cst_24 = arith.constant dense<0.000000e+00> : vector<128x32xf32>
    %43 = tpu.matmul %42, %0, %cst_24 {dimension_numbers = #tpu.dot_dimension_numbers<[1], [0], [0], [1], [0, 0, 1, 1], [], []>} : vector<128x50xf32>, vector<50x32xf32>, vector<128x32xf32> -> vector<128x32xf32>
    %c3_25 = arith.constant 3 : index
    %c0_26 = arith.constant 0 : index
    %c0_27 = arith.constant 0 : index
    %44 = vector.load %arg3[%c3_25, %c0_26, %c0_27] : memref<5x32x128xf32, #tpu.memory_space<vmem>>, vector<1x32x128xf32>
    %45 = vector.shape_cast %44 : vector<1x32x128xf32> to vector<32x128xf32>
    %cst_28 = arith.constant dense<0.000000e+00> : vector<128x128xf32>
    %46 = tpu.matmul %43, %45, %cst_28 {dimension_numbers = #tpu.dot_dimension_numbers<[1], [0], [0], [1], [0, 0, 1, 1], [], []>} : vector<128x32xf32>, vector<32x128xf32>, vector<128x128xf32> -> vector<128x128xf32>
    %47 = arith.addf %35, %46 : vector<128x128xf32>
    %c4 = arith.constant 4 : index
    %c0_29 = arith.constant 0 : index
    %c0_30 = arith.constant 0 : index
    %48 = vector.load %arg1[%c4, %c0_29, %c0_30] : memref<5x128x1xi32, #tpu.memory_space<vmem>>, vector<1x128x1xi32>
    %49 = vector.shape_cast %48 : vector<1x128x1xi32> to vector<128x1xi32>
    %50 = tpu.iota {dimensions = array<i32: 1>} : vector<128x50xi32>
    %51 = vector.broadcast %49 : vector<128x1xi32> to vector<128x50xi32>
    %52 = arith.cmpi eq, %50, %51 : vector<128x50xi32>
    %53 = arith.extui %52 : vector<128x50xi1> to vector<128x50xi32>
    %54 = arith.sitofp %53 : vector<128x50xi32> to vector<128x50xf32>
    %cst_31 = arith.constant dense<0.000000e+00> : vector<128x32xf32>
    %55 = tpu.matmul %54, %0, %cst_31 {dimension_numbers = #tpu.dot_dimension_numbers<[1], [0], [0], [1], [0, 0, 1, 1], [], []>} : vector<128x50xf32>, vector<50x32xf32>, vector<128x32xf32> -> vector<128x32xf32>
    %c4_32 = arith.constant 4 : index
    %c0_33 = arith.constant 0 : index
    %c0_34 = arith.constant 0 : index
    %56 = vector.load %arg3[%c4_32, %c0_33, %c0_34] : memref<5x32x128xf32, #tpu.memory_space<vmem>>, vector<1x32x128xf32>
    %57 = vector.shape_cast %56 : vector<1x32x128xf32> to vector<32x128xf32>
    %cst_35 = arith.constant dense<0.000000e+00> : vector<128x128xf32>
    %58 = tpu.matmul %55, %57, %cst_35 {dimension_numbers = #tpu.dot_dimension_numbers<[1], [0], [0], [1], [0, 0, 1, 1], [], []>} : vector<128x32xf32>, vector<32x128xf32>, vector<128x128xf32> -> vector<128x128xf32>
    %59 = arith.addf %47, %58 : vector<128x128xf32>
    %c0_36 = arith.constant 0 : index
    %c0_37 = arith.constant 0 : index
    %60 = vector.load %arg4[%c0_36, %c0_37] : memref<1x128xf32, #tpu.memory_space<vmem>>, vector<1x128xf32>
    %61 = vector.broadcast %60 : vector<1x128xf32> to vector<128x128xf32>
    %62 = arith.addf %59, %61 : vector<128x128xf32>
    %cst_38 = arith.constant 0.000000e+00 : f32
    %63 = vector.broadcast %cst_38 : f32 to vector<128x128xf32>
    %64 = arith.maximumf %62, %63 : vector<128x128xf32>
    %65 = vector.shape_cast %64 : vector<128x128xf32> to vector<8x16x128xf32>
    %c0_39 = arith.constant 0 : index
    %c0_40 = arith.constant 0 : index
    %66 = vector.load %arg5[%c0_39, %c0_40] : memref<16x128xf32, #tpu.memory_space<vmem>>, vector<16x128xf32>
    %67 = vector.shape_cast %66 : vector<16x128xf32> to vector<1x16x128xf32>
    %68 = vector.broadcast %67 : vector<1x16x128xf32> to vector<8x16x128xf32>
    %69 = arith.mulf %65, %68 : vector<8x16x128xf32>
    %cst_41 = arith.constant dense<0xFF800000> : vector<8x128xf32>
    %70 = vector.multi_reduction <maximumf>, %69, %cst_41 [1] : vector<8x16x128xf32> to vector<8x128xf32>
    %c0_42 = arith.constant 0 : index
    %c0_43 = arith.constant 0 : index
    %71 = vector.load %arg6[%c0_42, %c0_43] : memref<128x128xf32, #tpu.memory_space<vmem>>, vector<128x128xf32>
    %cst_44 = arith.constant dense<0.000000e+00> : vector<8x128xf32>
    %72 = tpu.matmul %70, %71, %cst_44 {dimension_numbers = #tpu.dot_dimension_numbers<[1], [0], [0], [1], [0, 0, 1, 1], [], []>} : vector<8x128xf32>, vector<128x128xf32>, vector<8x128xf32> -> vector<8x128xf32>
    %c0_45 = arith.constant 0 : index
    %c0_46 = arith.constant 0 : index
    %73 = vector.load %arg7[%c0_45, %c0_46] : memref<1x128xf32, #tpu.memory_space<vmem>>, vector<1x128xf32>
    %74 = vector.broadcast %73 : vector<1x128xf32> to vector<8x128xf32>
    %75 = arith.addf %72, %74 : vector<8x128xf32>
    %76 = arith.negf %75 : vector<8x128xf32>
    %77 = math.exp %76 : vector<8x128xf32>
    %cst_47 = arith.constant 1.000000e+00 : f32
    %78 = vector.broadcast %cst_47 : f32 to vector<8x128xf32>
    %79 = arith.addf %78, %77 : vector<8x128xf32>
    %80 = arith.divf %78, %79 : vector<8x128xf32>
    %c0_48 = arith.constant 0 : index
    %c0_49 = arith.constant 0 : index
    %81 = vector.load %arg8[%c0_48, %c0_49] : memref<8x128xf32, #tpu.memory_space<vmem>>, vector<8x128xf32>
    tpu.vector_store %arg8[%c0_48, %c0_49], %80 {strides = array<i32>} : memref<8x128xf32, #tpu.memory_space<vmem>>, vector<8x128xf32>,
    return
  }
  func.func @transform_0(%arg0: i32) -> (i32, i32, i32) {
    %c0_i32 = arith.constant 0 : i32
    %c0_i32_0 = arith.constant 0 : i32
    %c0_i32_1 = arith.constant 0 : i32
    return %c0_i32, %arg0, %c0_i32_0 : i32, i32, i32
  }
  func.func @transform_1(%arg0: i32) -> (i32, i32) {
    %c0_i32 = arith.constant 0 : i32
    %c0_i32_0 = arith.constant 0 : i32
    %c0_i32_1 = arith.constant 0 : i32
    return %c0_i32, %c0_i32_0 : i32, i32
  }
  func.func @transform_2(%arg0: i32) -> (i32, i32, i32) {
    %c0_i32 = arith.constant 0 : i32
    %c0_i32_0 = arith.constant 0 : i32
    %c0_i32_1 = arith.constant 0 : i32
    %c0_i32_2 = arith.constant 0 : i32
    return %c0_i32, %c0_i32_0, %c0_i32_1 : i32, i32, i32
  }
  func.func @transform_3(%arg0: i32) -> (i32, i32) {
    %c0_i32 = arith.constant 0 : i32
    %c0_i32_0 = arith.constant 0 : i32
    %c0_i32_1 = arith.constant 0 : i32
    return %c0_i32, %c0_i32_0 : i32, i32
  }
  func.func @transform_4(%arg0: i32) -> (i32, i32) {
    %c0_i32 = arith.constant 0 : i32
    %c0_i32_0 = arith.constant 0 : i32
    %c0_i32_1 = arith.constant 0 : i32
    return %c0_i32, %c0_i32_0 : i32, i32
  }
  func.func @transform_5(%arg0: i32) -> (i32, i32) {
    %c0_i32 = arith.constant 0 : i32
    %c0_i32_0 = arith.constant 0 : i32
    %c0_i32_1 = arith.constant 0 : i32
    return %c0_i32, %c0_i32_0 : i32, i32
  }
  func.func @transform_6(%arg0: i32) -> (i32, i32) {
    %c0_i32 = arith.constant 0 : i32
    %c0_i32_0 = arith.constant 0 : i32
    %c0_i32_1 = arith.constant 0 : i32
    return %c0_i32, %c0_i32_0 : i32, i32
  }
  func.func @transform_7(%arg0: i32) -> (i32, i32) {
    %c0_i32 = arith.constant 0 : i32
    %c0_i32_0 = arith.constant 0 : i32
    return %arg0, %c0_i32 : i32, i32
  }
}

</mosaic_0001>

<bundles_post_ra>
// kernel: cnn_forward.1
= control target key start
LH: loop header
LB: loop body
LE: loop exit
PB: predicated region body
PF: predicated region fallthrough
CT: control target
= control target key end

     0   :  { %s4753_s24 = smov 0   ;;  %s4755_s25 = smov 0   ;;  %s5662_s0 = inlined_call_operand.vmem [shape: s32[5,256,1], index: 0, kind: input, shape index: {}]   ;;  %s5663_s1 = inlined_call_operand.vmem [shape: f32[50,32], index: 1, kind: input, shape index: {}]   ;;  %s5664_s2 = inlined_call_operand.vmem [shape: f32[5,32,128], index: 2, kind: input, shape index: {}]   ;;  %s5665_s3 = inlined_call_operand.vmem [shape: f32[1,128], index: 3, kind: input, shape index: {}]   ;;  %s5666_s4 = inlined_call_operand.vmem [shape: f32[16,128], index: 4, kind: input, shape index: {}]   ;;  %s5667_s5 = inlined_call_operand.vmem [shape: f32[128,128], index: 5, kind: input, shape index: {}]   ;;  %s5668_s6 = inlined_call_operand.vmem [shape: f32[1,128], index: 6, kind: input, shape index: {}]   ;;  %s5669_s7 = inlined_call_operand.vmem [shape: f32[16,128], index: 7, kind: output, shape index: {}]  }
   0x1   :  { %s4757_s26 = smov 0  }
   0x2 LB: > { %s3505_s27 = sadd.s32 4294967295, %s4707_s26   ;;  %s4770_s28 = sadd.s32 1, %s4707_s26   ;;  %s4707_s26 = sphi %s4757_s26, %s5672_s26   ;;  %s4703_s25 = sphi %s4755_s25, %s5671_s25   ;;  %s4699_s24 = sphi %s4753_s24, %s5670_s24  }
   0x3   : > { %s21_s29 = ssub.s32 %s4707_s26, %s4770_s28  ;;  %s24_s30 = sadd.s32 1, %s4703_s25 }
   0x4   : > { %p22_p0 = scmp.eq.s32.totalorder %s21_s29, 0  ;;  %p31_p1 = scmp.ne.s32.totalorder %s4703_s25, %s4699_s24 }
   0x5   : > { %p32_p2 = scmp.eq.s32.totalorder %s4707_s26, 0  ;;  %p3508_p4 = scmp.ge.s32.totalorder %s4707_s26, 2 }
   0x6   : > { %s4779_s8 = scalar_select %p22_p0, %s4703_s25, %s24_s30  }
   0x7   : > { %p33_p3 = por %p32_p2, %p31_p1  ;;  %227 = sbr.rel (%p3508_p4) target bundleno = 59 (0x3b), region = 40 }
   0xe   : > { %230 = sbr.rel (!%p33_p3) target bundleno = 59 (0x3b), region = 44  ;;  %s232_s9 = sand.u32 (%p33_p3), 1, %s4703_s25  }
   0xf   : > { %s3843_s10 = sshll.u32 (%p33_p3), %s4707_s26, 7  ;;  %s4649_s11 = smul.u32 (%p33_p3), 640, %s232_s9 }
  0x10   : > { %s4787_s14 = scalar_lea.vmem (%p33_p3), %s5662_s0, %s3843_s10 }
  0x11   : > { %v423_v0 = vld [vmem:[%s4787_s14] sm:$0xff] (%p33_p3)  ;;  %v425_v1 = vld [vmem:[%s4787_s14 + $0x8] sm:$0xff] (%p33_p3)  ;;  %v427_v2 = vld [vmem:[%s4787_s14 + $0x10] sm:$0xff] (%p33_p3)  ;;  %s4795_s15 = scalar_lea.vmem (%p33_p3), [#allocation2], %s4649_s11 }
  0x12   : > { %v429_v3 = vld [vmem:[%s4787_s14 + $0x18] sm:$0xff] (%p33_p3)  ;;  %v431_v4 = vld [vmem:[%s4787_s14 + $0x20] sm:$0xff] (%p33_p3)  ;;  %v433_v5 = vld [vmem:[%s4787_s14 + $0x28] sm:$0xff] (%p33_p3)  ;;  %424 = vst [vmem:[%s4795_s15] sm:$0xff] (%p33_p3), %v423_v0 }
  0x13   : > { %426 = vst [vmem:[%s4795_s15 + $0x8] sm:$0xff] (%p33_p3), %v425_v1  ;;  %428 = vst [vmem:[%s4795_s15 + $0x10] sm:$0xff] (%p33_p3), %v427_v2  ;;  %v435_v6 = vld [vmem:[%s4787_s14 + $0x30] sm:$0xff] (%p33_p3)  ;;  %v437_v7 = vld [vmem:[%s4787_s14 + $0x38] sm:$0xff] (%p33_p3) }
  0x14   : > { %430 = vst [vmem:[%s4795_s15 + $0x18] sm:$0xff] (%p33_p3), %v429_v3  ;;  %432 = vst [vmem:[%s4795_s15 + $0x20] sm:$0xff] (%p33_p3), %v431_v4  ;;  %v439_v8 = vld [vmem:[%s4787_s14 + $0x40] sm:$0xff] (%p33_p3)  ;;  %v441_v9 = vld [vmem:[%s4787_s14 + $0x48] sm:$0xff] (%p33_p3) }
  0x15   : > { %434 = vst [vmem:[%s4795_s15 + $0x28] sm:$0xff] %v433_v5  ;;  %436 = vst [vmem:[%s4795_s15 + $0x30] sm:$0xff] %v435_v6  ;;  %v443_v10 = vld [vmem:[%s4787_s14 + $0x50] sm:$0xff]  ;;  %v445_v11 = vld [vmem:[%s4787_s14 + $0x58] sm:$0xff] }
  0x16   : > { %438 = vst [vmem:[%s4795_s15 + $0x38] sm:$0xff] %v437_v7  ;;  %440 = vst [vmem:[%s4795_s15 + $0x40] sm:$0xff] %v439_v8  ;;  %v447_v12 = vld [vmem:[%s4787_s14 + $0x60] sm:$0xff]  ;;  %v449_v13 = vld [vmem:[%s4787_s14 + $0x68] sm:$0xff] }
  0x17   : > { %442 = vst [vmem:[%s4795_s15 + $0x48] sm:$0xff] %v441_v9  ;;  %444 = vst [vmem:[%s4795_s15 + $0x50] sm:$0xff] %v443_v10  ;;  %v451_v14 = vld [vmem:[%s4787_s14 + $0x70] sm:$0xff]  ;;  %v453_v15 = vld [vmem:[%s4787_s14 + $0x78] sm:$0xff] }
  0x18   : > { %446 = vst [vmem:[%s4795_s15 + $0x58] sm:$0xff] %v445_v11  ;;  %448 = vst [vmem:[%s4795_s15 + $0x60] sm:$0xff] %v447_v12  ;;  %v455_v16 = vld [vmem:[%s4787_s14 + $0x100] sm:$0xff]  ;;  %v457_v17 = vld [vmem:[%s4787_s14 + $0x108] sm:$0xff] }
  0x19   : > { %450 = vst [vmem:[%s4795_s15 + $0x68] sm:$0xff] %v449_v13  ;;  %452 = vst [vmem:[%s4795_s15 + $0x70] sm:$0xff] %v451_v14  ;;  %v459_v18 = vld [vmem:[%s4787_s14 + $0x110] sm:$0xff]  ;;  %v461_v19 = vld [vmem:[%s4787_s14 + $0x118] sm:$0xff] }
  0x1a   : > { %454 = vst [vmem:[%s4795_s15 + $0x78] sm:$0xff] %v453_v15  ;;  %456 = vst [vmem:[%s4795_s15 + $0x80] sm:$0xff] %v455_v16  ;;  %v463_v20 = vld [vmem:[%s4787_s14 + $0x120] sm:$0xff]  ;;  %v465_v21 = vld [vmem:[%s4787_s14 + $0x128] sm:$0xff] }
  0x1b   : > { %458 = vst [vmem:[%s4795_s15 + $0x88] sm:$0xff] %v457_v17  ;;  %460 = vst [vmem:[%s4795_s15 + $0x90] sm:$0xff] %v459_v18  ;;  %v467_v22 = vld [vmem:[%s4787_s14 + $0x130] sm:$0xff]  ;;  %v469_v23 = vld [vmem:[%s4787_s14 + $0x138] sm:$0xff] }
  0x1c   : > { %462 = vst [vmem:[%s4795_s15 + $0x98] sm:$0xff] %v461_v19  ;;  %464 = vst [vmem:[%s4795_s15 + $0xa0] sm:$0xff] %v463_v20  ;;  %v471_v24 = vld [vmem:[%s4787_s14 + $0x140] sm:$0xff]  ;;  %v473_v25 = vld [vmem:[%s4787_s14 + $0x148] sm:$0xff] }
  0x1d   : > { %466 = vst [vmem:[%s4795_s15 + $0xa8] sm:$0xff] %v465_v21  ;;  %468 = vst [vmem:[%s4795_s15 + $0xb0] sm:$0xff] %v467_v22  ;;  %v475_v26 = vld [vmem:[%s4787_s14 + $0x150] sm:$0xff]  ;;  %v477_v27 = vld [vmem:[%s4787_s14 + $0x158] sm:$0xff] }
  0x1e   : > { %470 = vst [vmem:[%s4795_s15 + $0xb8] sm:$0xff] %v469_v23  ;;  %472 = vst [vmem:[%s4795_s15 + $0xc0] sm:$0xff] %v471_v24  ;;  %v479_v28 = vld [vmem:[%s4787_s14 + $0x160] sm:$0xff]  ;;  %v481_v29 = vld [vmem:[%s4787_s14 + $0x168] sm:$0xff] }
  0x1f   : > { %474 = vst [vmem:[%s4795_s15 + $0xc8] sm:$0xff] %v473_v25  ;;  %476 = vst [vmem:[%s4795_s15 + $0xd0] sm:$0xff] %v475_v26  ;;  %v483_v30 = vld [vmem:[%s4787_s14 + $0x170] sm:$0xff]  ;;  %v485_v31 = vld [vmem:[%s4787_s14 + $0x178] sm:$0xff] }
  0x20   : > { %478 = vst [vmem:[%s4795_s15 + $0xd8] sm:$0xff] %v477_v27  ;;  %480 = vst [vmem:[%s4795_s15 + $0xe0] sm:$0xff] %v479_v28  ;;  %v487_v32 = vld [vmem:[%s4787_s14 + $0x200] sm:$0xff]  ;;  %v489_v33 = vld [vmem:[%s4787_s14 + $0x208] sm:$0xff] }
  0x21   : > { %482 = vst [vmem:[%s4795_s15 + $0xe8] sm:$0xff] %v481_v29  ;;  %484 = vst [vmem:[%s4795_s15 + $0xf0] sm:$0xff] %v483_v30  ;;  %v491_v34 = vld [vmem:[%s4787_s14 + $0x210] sm:$0xff]  ;;  %v493_v35 = vld [vmem:[%s4787_s14 + $0x218] sm:$0xff] }
  0x22   : > { %486 = vst [vmem:[%s4795_s15 + $0xf8] sm:$0xff] %v485_v31  ;;  %488 = vst [vmem:[%s4795_s15 + $0x100] sm:$0xff] %v487_v32  ;;  %v495_v36 = vld [vmem:[%s4787_s14 + $0x220] sm:$0xff]  ;;  %v497_v37 = vld [vmem:[%s4787_s14 + $0x228] sm:$0xff] }
  0x23   : > { %490 = vst [vmem:[%s4795_s15 + $0x108] sm:$0xff] %v489_v33  ;;  %492 = vst [vmem:[%s4795_s15 + $0x110] sm:$0xff] %v491_v34  ;;  %v499_v38 = vld [vmem:[%s4787_s14 + $0x230] sm:$0xff]  ;;  %v501_v39 = vld [vmem:[%s4787_s14 + $0x238] sm:$0xff] }
  0x24   : > { %494 = vst [vmem:[%s4795_s15 + $0x118] sm:$0xff] %v493_v35  ;;  %496 = vst [vmem:[%s4795_s15 + $0x120] sm:$0xff] %v495_v36  ;;  %v503_v40 = vld [vmem:[%s4787_s14 + $0x240] sm:$0xff]  ;;  %v505_v41 = vld [vmem:[%s4787_s14 + $0x248] sm:$0xff] }
  0x25   : > { %498 = vst [vmem:[%s4795_s15 + $0x128] sm:$0xff] %v497_v37  ;;  %500 = vst [vmem:[%s4795_s15 + $0x130] sm:$0xff] %v499_v38  ;;  %v507_v42 = vld [vmem:[%s4787_s14 + $0x250] sm:$0xff]  ;;  %v509_v43 = vld [vmem:[%s4787_s14 + $0x258] sm:$0xff] }
  0x26   : > { %502 = vst [vmem:[%s4795_s15 + $0x138] sm:$0xff] %v501_v39  ;;  %504 = vst [vmem:[%s4795_s15 + $0x140] sm:$0xff] %v503_v40  ;;  %v511_v44 = vld [vmem:[%s4787_s14 + $0x260] sm:$0xff]  ;;  %v513_v45 = vld [vmem:[%s4787_s14 + $0x268] sm:$0xff] }
  0x27   : > { %506 = vst [vmem:[%s4795_s15 + $0x148] sm:$0xff] %v505_v41  ;;  %508 = vst [vmem:[%s4795_s15 + $0x150] sm:$0xff] %v507_v42  ;;  %v515_v46 = vld [vmem:[%s4787_s14 + $0x270] sm:$0xff]  ;;  %v517_v47 = vld [vmem:[%s4787_s14 + $0x278] sm:$0xff] }
  0x28   : > { %510 = vst [vmem:[%s4795_s15 + $0x158] sm:$0xff] %v509_v43  ;;  %512 = vst [vmem:[%s4795_s15 + $0x160] sm:$0xff] %v511_v44  ;;  %v519_v48 = vld [vmem:[%s4787_s14 + $0x300] sm:$0xff]  ;;  %v521_v49 = vld [vmem:[%s4787_s14 + $0x308] sm:$0xff] }
  0x29   : > { %514 = vst [vmem:[%s4795_s15 + $0x168] sm:$0xff] %v513_v45  ;;  %516 = vst [vmem:[%s4795_s15 + $0x170] sm:$0xff] %v515_v46  ;;  %v523_v50 = vld [vmem:[%s4787_s14 + $0x310] sm:$0xff]  ;;  %v525_v51 = vld [vmem:[%s4787_s14 + $0x318] sm:$0xff] }
  0x2a   : > { %518 = vst [vmem:[%s4795_s15 + $0x178] sm:$0xff] %v517_v47  ;;  %520 = vst [vmem:[%s4795_s15 + $0x180] sm:$0xff] %v519_v48  ;;  %v527_v52 = vld [vmem:[%s4787_s14 + $0x320] sm:$0xff]  ;;  %v529_v53 = vld [vmem:[%s4787_s14 + $0x328] sm:$0xff] }
  0x2b   : > { %522 = vst [vmem:[%s4795_s15 + $0x188] sm:$0xff] %v521_v49  ;;  %524 = vst [vmem:[%s4795_s15 + $0x190] sm:$0xff] %v523_v50  ;;  %v531_v54 = vld [vmem:[%s4787_s14 + $0x330] sm:$0xff]  ;;  %v533_v55 = vld [vmem:[%s4787_s14 + $0x338] sm:$0xff] }
  0x2c   : > { %526 = vst [vmem:[%s4795_s15 + $0x198] sm:$0xff] %v525_v51  ;;  %528 = vst [vmem:[%s4795_s15 + $0x1a0] sm:$0xff] %v527_v52  ;;  %v535_v56 = vld [vmem:[%s4787_s14 + $0x340] sm:$0xff]  ;;  %v537_v57 = vld [vmem:[%s4787_s14 + $0x348] sm:$0xff] }
  0x2d   : > { %530 = vst [vmem:[%s4795_s15 + $0x1a8] sm:$0xff] %v529_v53  ;;  %532 = vst [vmem:[%s4795_s15 + $0x1b0] sm:$0xff] %v531_v54  ;;  %v539_v58 = vld [vmem:[%s4787_s14 + $0x350] sm:$0xff]  ;;  %v541_v59 = vld [vmem:[%s4787_s14 + $0x358] sm:$0xff] }
  0x2e   : > { %534 = vst [vmem:[%s4795_s15 + $0x1b8] sm:$0xff] %v533_v55  ;;  %536 = vst [vmem:[%s4795_s15 + $0x1c0] sm:$0xff] %v535_v56  ;;  %v543_v60 = vld [vmem:[%s4787_s14 + $0x360] sm:$0xff]  ;;  %v545_v61 = vld [vmem:[%s4787_s14 + $0x368] sm:$0xff] }
  0x2f   : > { %538 = vst [vmem:[%s4795_s15 + $0x1c8] sm:$0xff] %v537_v57  ;;  %540 = vst [vmem:[%s4795_s15 + $0x1d0] sm:$0xff] %v539_v58  ;;  %v547_v62 = vld [vmem:[%s4787_s14 + $0x370] sm:$0xff]  ;;  %v549_v63 = vld [vmem:[%s4787_s14 + $0x378] sm:$0xff] }
  0x30   : > { %542 = vst [vmem:[%s4795_s15 + $0x1d8] sm:$0xff] %v541_v59  ;;  %544 = vst [vmem:[%s4795_s15 + $0x1e0] sm:$0xff] %v543_v60  ;;  %v551_v0 = vld [vmem:[%s4787_s14 + $0x400] sm:$0xff]  ;;  %v553_v1 = vld [vmem:[%s4787_s14 + $0x408] sm:$0xff] }
  0x31   : > { %546 = vst [vmem:[%s4795_s15 + $0x1e8] sm:$0xff] %v545_v61  ;;  %548 = vst [vmem:[%s4795_s15 + $0x1f0] sm:$0xff] %v547_v62  ;;  %v555_v2 = vld [vmem:[%s4787_s14 + $0x410] sm:$0xff]  ;;  %v557_v3 = vld [vmem:[%s4787_s14 + $0x418] sm:$0xff] }
  0x32   : > { %550 = vst [vmem:[%s4795_s15 + $0x1f8] sm:$0xff] %v549_v63  ;;  %552 = vst [vmem:[%s4795_s15 + $0x200] sm:$0xff] %v551_v0  ;;  %v559_v4 = vld [vmem:[%s4787_s14 + $0x420] sm:$0xff]  ;;  %v561_v5 = vld [vmem:[%s4787_s14 + $0x428] sm:$0xff] }
  0x33   : > { %554 = vst [vmem:[%s4795_s15 + $0x208] sm:$0xff] %v553_v1  ;;  %556 = vst [vmem:[%s4795_s15 + $0x210] sm:$0xff] %v555_v2  ;;  %v563_v6 = vld [vmem:[%s4787_s14 + $0x430] sm:$0xff]  ;;  %v565_v7 = vld [vmem:[%s4787_s14 + $0x438] sm:$0xff] }
  0x34   : > { %558 = vst [vmem:[%s4795_s15 + $0x218] sm:$0xff] %v557_v3  ;;  %560 = vst [vmem:[%s4795_s15 + $0x220] sm:$0xff] %v559_v4  ;;  %v567_v8 = vld [vmem:[%s4787_s14 + $0x440] sm:$0xff]  ;;  %v569_v9 = vld [vmem:[%s4787_s14 + $0x448] sm:$0xff] }
  0x35   : > { %562 = vst [vmem:[%s4795_s15 + $0x228] sm:$0xff] %v561_v5  ;;  %564 = vst [vmem:[%s4795_s15 + $0x230] sm:$0xff] %v563_v6  ;;  %v571_v10 = vld [vmem:[%s4787_s14 + $0x450] sm:$0xff]  ;;  %v573_v11 = vld [vmem:[%s4787_s14 + $0x458] sm:$0xff] }
  0x36   : > { %566 = vst [vmem:[%s4795_s15 + $0x238] sm:$0xff] %v565_v7  ;;  %568 = vst [vmem:[%s4795_s15 + $0x240] sm:$0xff] %v567_v8  ;;  %v575_v12 = vld [vmem:[%s4787_s14 + $0x460] sm:$0xff]  ;;  %v577_v13 = vld [vmem:[%s4787_s14 + $0x468] sm:$0xff] }
  0x37   : > { %570 = vst [vmem:[%s4795_s15 + $0x248] sm:$0xff] %v569_v9  ;;  %572 = vst [vmem:[%s4795_s15 + $0x250] sm:$0xff] %v571_v10  ;;  %v579_v14 = vld [vmem:[%s4787_s14 + $0x470] sm:$0xff]  ;;  %v581_v15 = vld [vmem:[%s4787_s14 + $0x478] sm:$0xff] }
  0x38   : > { %574 = vst [vmem:[%s4795_s15 + $0x258] sm:$0xff] %v573_v11  ;;  %576 = vst [vmem:[%s4795_s15 + $0x260] sm:$0xff] %v575_v12 }
  0x39   : > { %578 = vst [vmem:[%s4795_s15 + $0x268] sm:$0xff] %v577_v13  ;;  %580 = vst [vmem:[%s4795_s15 + $0x270] sm:$0xff] %v579_v14 }
  0x3a   : > { %582 = vst [vmem:[%s4795_s15 + $0x278] sm:$0xff] %v581_v15 }
  0x3b PF: > { %p3511_p5 = scmp.ge.s32.totalorder %s4707_s26, 1  ;;  %p587_p6 = scmp.lt.s32.totalorder %s4707_s26, 3 }
  0x3d   : > { %p588_p7 = pnand %p3511_p5, %p587_p6 }
  0x3e   : > { %s594_s16 = sand.u32 (!%p588_p7), 1, %s4699_s24   ;;  %v629_v16 = vld [vmem:[%s5663_s1] sm:$0xff] (!%p588_p7)  ;;  %v630_v17 = vld [vmem:[%s5663_s1 + $0x8] sm:$0xff] (!%p588_p7)  ;;  %v631_v18 = vld [vmem:[%s5663_s1 + $0x10] sm:$0xff] (!%p588_p7)  ;;  %v4709_v19 = vmov (!%p588_p7), 0   ;;  %vm799_vm0 = vcmask (!%p588_p7), 1041408  }
  0x3f   : > { %591 = sbr.rel (%p588_p7) target bundleno = 1079 (0x437), region = 82  ;;  %4680 = vset.pattern.permute.xlu1 (!%p588_p7), %v4709_v19  ;;  %4679 = vset.pattern.permute.xlu0 (!%p588_p7), %v4709_v19  ;;  %v4963_v20 = vpack.c.bf16 (!%p588_p7), %v630_v17, %v629_v16  ;;  %v632_v21 = vld [vmem:[%s5663_s1 + $0x18] sm:$0xff] (!%p588_p7)  ;;  %v633_v23 = vld [vmem:[%s5663_s1 + $0x20] sm:$0xff] (!%p588_p7)  ;;  %v634_v24 = vld [vmem:[%s5663_s1 + $0x28] sm:$0xff] (!%p588_p7)  ;;  %vm750_vm1 = vcmask (!%p588_p7), 408576   ;;  %p625_p8 = scmp.lt.s32.totalorder (!%p588_p7), %s3505_s27, 1 }
  0x40   : > { %s4650_s23 = smul.u32 (!%p588_p7), 640, %s594_s16  ;;  %v4968_v22 = vpack.c.bf16 (!%p588_p7), %v632_v21, %v631_v18  ;;  %v4985_v29 = vpack.c.bf16 (!%p588_p7), %v634_v24, %v633_v23  ;;  %v5003_v40 = vld [vmem:[%s5663_s1 + $0x30] sm:$0x3] (!%p588_p7) }
  0x41   : > { %4462 = vmatprep.subr.bf16.mxu1 (!%p588_p7), %v4963_v20 }
  0x42   : > { %s4977_s12 = scalar_lea.vmem (!%p588_p7), [#allocation2], %s4650_s23  ;;  %4464 = vmatpush3.bf16.msra.mxu1 (!%p588_p7), %v4963_v20 }
  0x43   : > { %v638_v25 = vld [vmem:[%s4977_s12 + $0x10] sm:$0xff] (!%p588_p7)  ;;  %v636_v26 = vld [vmem:[%s4977_s12] sm:$0xff] (!%p588_p7)  ;;  %v639_v27 = vld [vmem:[%s4977_s12 + $0x18] sm:$0xff] (!%p588_p7)  ;;  %4466 = vmatprep.subr.bf16.mxu1 (!%p588_p7), %v4968_v22 }
  0x44   : > { %661 = vperm.xlu1 (!%p588_p7), %4680, %v638_v25   ;;  %655 = vperm.xlu0 (!%p588_p7), %4679, %v636_v26   ;;  %v637_v28 = vld [vmem:[%s4977_s12 + $0x8] sm:$0xff] (!%p588_p7)  ;;  %v640_v31 = vld [vmem:[%s4977_s12 + $0x20] sm:$0xff] (!%p588_p7)  ;;  %v643_v32 = vld [vmem:[%s4977_s12 + $0x38] sm:$0xff] (!%p588_p7) }
  0x45   : > { %v641_v30 = vld [vmem:[%s4977_s12 + $0x28] sm:$0xff] (!%p588_p7)  ;;  %v642_v33 = vld [vmem:[%s4977_s12 + $0x30] sm:$0xff] (!%p588_p7)  ;;  %v644_v35 = vld [vmem:[%s4977_s12 + $0x40] sm:$0xff] (!%p588_p7) }
  0x46   : > { %4468 = vmatpush3.bf16.msra.mxu1 %v4968_v22  ;;  %v645_v34 = vld [vmem:[%s4977_s12 + $0x48] sm:$0xff]  ;;  %v647_v36 = vld [vmem:[%s4977_s12 + $0x58] sm:$0xff]  ;;  %v646_v37 = vld [vmem:[%s4977_s12 + $0x50] sm:$0xff]  ;;  %s5674_s27 = smov (!%p625_p8, %s3505_s27), 1 }
  0x47   : > { %4470 = vmatprep.subr.bf16.mxu1 %v4985_v29  ;;  %v649_v38 = vld [vmem:[%s4977_s12 + $0x68] sm:$0xff]  ;;  %v648_v39 = vld [vmem:[%s4977_s12 + $0x60] sm:$0xff]  ;;  %v651_v41 = vld [vmem:[%s4977_s12 + $0x78] sm:$0xff]  ;;  %s3512_s23 = sshll.u32 %s5674_s27, 3 }
  0x48   : > { %664 = vperm.xlu1 %4680, %v639_v27   ;;  %658 = vperm.xlu0 %4679, %v637_v28   ;;  %v650_v42 = vld [vmem:[%s4977_s12 + $0x70] sm:$0xff]  ;;  %v3547_v43 = vld [vmem:[%s4977_s12 + $0x88] sm:$0xff]  ;;  %v3546_v44 = vld [vmem:[%s4977_s12 + $0x80] sm:$0xff]  ;;  %v652_v27 = vlaneseq  ;;  %s628_s30 = scalar_lea.vmem %s5669_s7, %s3512_s23 }
  0x49   : > { %v3549_v45 = vld [vmem:[%s4977_s12 + $0x98] sm:$0xff]  ;;  %v3548_v46 = vld [vmem:[%s4977_s12 + $0x90] sm:$0xff]  ;;  %v3551_v47 = vld [vmem:[%s4977_s12 + $0xa8] sm:$0xff] }
  0x4a   : > { %4472 = vmatpush3.bf16.msra.mxu1 %v4985_v29  ;;  %v3550_v48 = vld [vmem:[%s4977_s12 + $0xa0] sm:$0xff]  ;;  %v3553_v49 = vld [vmem:[%s4977_s12 + $0xb8] sm:$0xff]  ;;  %v3552_v50 = vld [vmem:[%s4977_s12 + $0xb0] sm:$0xff] }
  0x4b   : > { %4088 = vmatprep.subr.msk.mxu1 %vm799_vm0, %v5003_v40  ;;  %v3555_v51 = vld [vmem:[%s4977_s12 + $0xc8] sm:$0xff]  ;;  %v3554_v52 = vld [vmem:[%s4977_s12 + $0xc0] sm:$0xff]  ;;  %v3557_v53 = vld [vmem:[%s4977_s12 + $0xd8] sm:$0xff] }
  0x4c   : > { %670 = vperm.xlu1 %4680, %v641_v30   ;;  %667 = vperm.xlu0 %4679, %v640_v31   ;;  %v3556_v54 = vld [vmem:[%s4977_s12 + $0xd0] sm:$0xff]  ;;  %v3559_v55 = vld [vmem:[%s4977_s12 + $0xe8] sm:$0xff]  ;;  %v3558_v56 = vld [vmem:[%s4977_s12 + $0xe0] sm:$0xff]  ;;  %v5060_v31 = vand.u32 127, %v652_v27 }
  0x4d   : > { %v3561_v57 = vld [vmem:[%s4977_s12 + $0xf8] sm:$0xff]  ;;  %v3560_v58 = vld [vmem:[%s4977_s12 + $0xf0] sm:$0xff]  ;;  %v3632_v59 = vld [vmem:[%s4977_s12 + $0x108] sm:$0xff] }
  0x4e   : > { %4089 = vmatpush3.msk.msra.mxu1 %vm799_vm0, %v5003_v40  ;;  %v3631_v60 = vld [vmem:[%s4977_s12 + $0x100] sm:$0xff]  ;;  %v3634_v61 = vld [vmem:[%s4977_s12 + $0x118] sm:$0xff]  ;;  %v3633_v62 = vld [vmem:[%s4977_s12 + $0x110] sm:$0xff] }
  0x4f   : > { %4474 = vmatprep.subr.bf16.mxu1 %v4963_v20  ;;  %v3636_v63 = vld [vmem:[%s4977_s12 + $0x128] sm:$0xff]  ;;  %v3635_v0 = vld [vmem:[%s4977_s12 + $0x120] sm:$0xff]  ;;  %v3638_v1 = vld [vmem:[%s4977_s12 + $0x138] sm:$0xff] }
  0x50   : > { %676 = vperm.xlu1 %4680, %v643_v32   ;;  %673 = vperm.xlu0 %4679, %v642_v33   ;;  %v3637_v2 = vld [vmem:[%s4977_s12 + $0x130] sm:$0xff]  ;;  %v3640_v3 = vld [vmem:[%s4977_s12 + $0x148] sm:$0xff]  ;;  %v3639_v4 = vld [vmem:[%s4977_s12 + $0x140] sm:$0xff] }
  0x51   : > { %v3642_v5 = vld [vmem:[%s4977_s12 + $0x158] sm:$0xff]  ;;  %v3641_v6 = vld [vmem:[%s4977_s12 + $0x150] sm:$0xff]  ;;  %v3644_v7 = vld [vmem:[%s4977_s12 + $0x168] sm:$0xff] }
  0x52   : > { %v3643_v8 = vld [vmem:[%s4977_s12 + $0x160] sm:$0xff]  ;;  %v3646_v9 = vld [vmem:[%s4977_s12 + $0x178] sm:$0xff]  ;;  %v3645_v10 = vld [vmem:[%s4977_s12 + $0x170] sm:$0xff] }
  0x53   : > { %v3701_v11 = vld [vmem:[%s4977_s12 + $0x188] sm:$0xff]  ;;  %v3700_v12 = vld [vmem:[%s4977_s12 + $0x180] sm:$0xff]  ;;  %v3703_v13 = vld [vmem:[%s4977_s12 + $0x198] sm:$0xff] }
  0x54   : > { %682 = vperm.xlu1 %4680, %v645_v34   ;;  %679 = vperm.xlu0 %4679, %v644_v35   ;;  %v3702_v14 = vld [vmem:[%s4977_s12 + $0x190] sm:$0xff]  ;;  %v3705_v15 = vld [vmem:[%s4977_s12 + $0x1a8] sm:$0xff]  ;;  %v3704_v16 = vld [vmem:[%s4977_s12 + $0x1a0] sm:$0xff] }
  0x55   : > { %v3707_v17 = vld [vmem:[%s4977_s12 + $0x1b8] sm:$0xff]  ;;  %v3706_v18 = vld [vmem:[%s4977_s12 + $0x1b0] sm:$0xff]  ;;  %v3709_v19 = vld [vmem:[%s4977_s12 + $0x1c8] sm:$0xff] }
  0x56   : > { %v3708_v21 = vld [vmem:[%s4977_s12 + $0x1c0] sm:$0xff]  ;;  %v3711_v23 = vld [vmem:[%s4977_s12 + $0x1d8] sm:$0xff]  ;;  %v3710_v24 = vld [vmem:[%s4977_s12 + $0x1d0] sm:$0xff] }
  0x57   : > { %v3713_v25 = vld [vmem:[%s4977_s12 + $0x1e8] sm:$0xff]  ;;  %v3712_v26 = vld [vmem:[%s4977_s12 + $0x1e0] sm:$0xff]  ;;  %v3715_v28 = vld [vmem:[%s4977_s12 + $0x1f8] sm:$0xff] }
  0x58   : > { %688 = vperm.xlu1 %4680, %v647_v36   ;;  %685 = vperm.xlu0 %4679, %v646_v37   ;;  %v3714_v30 = vld [vmem:[%s4977_s12 + $0x1f0] sm:$0xff]  ;;  %v3770_v32 = vld [vmem:[%s4977_s12 + $0x208] sm:$0xff]  ;;  %v3769_v33 = vld [vmem:[%s4977_s12 + $0x200] sm:$0xff]  ;;  %v4710_v36 = vmov 0.0  }
  0x5c   : > { %694 = vperm.xlu1 %4680, %v649_v38   ;;  %691 = vperm.xlu0 %4679, %v648_v39   ;;  %v3772_v38 = vld [vmem:[%s4977_s12 + $0x218] sm:$0xff]  ;;  %v3771_v39 = vld [vmem:[%s4977_s12 + $0x210] sm:$0xff] }
  0x60   : > { %700 = vperm.xlu1 %4680, %v651_v41   ;;  %697 = vperm.xlu0 %4679, %v650_v42  }
  0x64   : > { %973 = vperm.xlu1 %4680, %v3547_v43   ;;  %970 = vperm.xlu0 %4679, %v3546_v44  }
  0x68   : > { %979 = vperm.xlu1 %4680, %v3549_v45   ;;  %976 = vperm.xlu0 %4679, %v3548_v46   ;;  %v3774_v45 = vld [vmem:[%s4977_s12 + $0x228] sm:$0xff]  ;;  %v3773_v46 = vld [vmem:[%s4977_s12 + $0x220] sm:$0xff] }
  0x6c   : > { %985 = vperm.xlu1 %4680, %v3551_v47   ;;  %982 = vperm.xlu0 %4679, %v3550_v48  }
  0x70   : > { %991 = vperm.xlu1 %4680, %v3553_v49   ;;  %988 = vperm.xlu0 %4679, %v3552_v50  }
  0x74   : > { %997 = vperm.xlu1 %4680, %v3555_v51   ;;  %994 = vperm.xlu0 %4679, %v3554_v52   ;;  %v3776_v51 = vld [vmem:[%s4977_s12 + $0x238] sm:$0xff]  ;;  %v3775_v52 = vld [vmem:[%s4977_s12 + $0x230] sm:$0xff] }
  0x78   : > { %1003 = vperm.xlu1 %4680, %v3557_v53   ;;  %1000 = vperm.xlu0 %4679, %v3556_v54  }
  0x7c   : > { %1009 = vperm.xlu1 %4680, %v3559_v55   ;;  %1006 = vperm.xlu0 %4679, %v3558_v56  }
  0x80   : > { %1015 = vperm.xlu1 %4680, %v3561_v57   ;;  %1012 = vperm.xlu0 %4679, %v3560_v58   ;;  %v3778_v57 = vld [vmem:[%s4977_s12 + $0x248] sm:$0xff]  ;;  %v3777_v58 = vld [vmem:[%s4977_s12 + $0x240] sm:$0xff] }
  0x84   : > { %1671 = vperm.xlu1 %4680, %v3632_v59   ;;  %1668 = vperm.xlu0 %4679, %v3631_v60  }
  0x88   : > { %1677 = vperm.xlu1 %4680, %v3634_v61   ;;  %1674 = vperm.xlu0 %4679, %v3633_v62  }
  0x8c   : > { %1683 = vperm.xlu1 %4680, %v3636_v63   ;;  %1680 = vperm.xlu0 %4679, %v3635_v0   ;;  %v3780_v63 = vld [vmem:[%s4977_s12 + $0x258] sm:$0xff]  ;;  %v3779_v0 = vld [vmem:[%s4977_s12 + $0x250] sm:$0xff] }
  0x90   : > { %1689 = vperm.xlu1 %4680, %v3638_v1   ;;  %1686 = vperm.xlu0 %4679, %v3637_v2  }
  0x94   : > { %1695 = vperm.xlu1 %4680, %v3640_v3   ;;  %1692 = vperm.xlu0 %4679, %v3639_v4  }
  0x98   : > { %1701 = vperm.xlu1 %4680, %v3642_v5   ;;  %1698 = vperm.xlu0 %4679, %v3641_v6   ;;  %v3782_v5 = vld [vmem:[%s4977_s12 + $0x268] sm:$0xff]  ;;  %v3781_v6 = vld [vmem:[%s4977_s12 + $0x260] sm:$0xff] }
  0x9c   : > { %1707 = vperm.xlu1 %4680, %v3644_v7   ;;  %1704 = vperm.xlu0 %4679, %v3643_v8  }
  0xa0   : > { %1713 = vperm.xlu1 %4680, %v3646_v9   ;;  %1710 = vperm.xlu0 %4679, %v3645_v10  }
  0xa4   : > { %2191 = vperm.xlu1 %4680, %v3701_v11   ;;  %2188 = vperm.xlu0 %4679, %v3700_v12   ;;  %v3784_v11 = vld [vmem:[%s4977_s12 + $0x278] sm:$0xff]  ;;  %v3783_v12 = vld [vmem:[%s4977_s12 + $0x270] sm:$0xff] }
  0xa8   : > { %2197 = vperm.xlu1 %4680, %v3703_v13   ;;  %2194 = vperm.xlu0 %4679, %v3702_v14  }
  0xac   : > { %2203 = vperm.xlu1 %4680, %v3705_v15   ;;  %2200 = vperm.xlu0 %4679, %v3704_v16  }
  0xb0   : > { %2209 = vperm.xlu1 %4680, %v3707_v17   ;;  %2206 = vperm.xlu0 %4679, %v3706_v18  }
  0xb4   : > { %2215 = vperm.xlu1 %4680, %v3709_v19   ;;  %2212 = vperm.xlu0 %4679, %v3708_v21  }
  0xb8   : > { %2221 = vperm.xlu1 %4680, %v3711_v23   ;;  %2218 = vperm.xlu0 %4679, %v3710_v24  }
  0xbc   : > { %2227 = vperm.xlu1 %4680, %v3713_v25   ;;  %2224 = vperm.xlu0 %4679, %v3712_v26  }
  0xc0   : > { %2233 = vperm.xlu1 %4680, %v3715_v28   ;;  %2230 = vperm.xlu0 %4679, %v3714_v30  }
  0xc3   : > { %v662_v34 = vpop.permute.xlu1 %661  ;;  %v656_v35 = vpop.permute.xlu0 %655 }
  0xc4   : > { %vm702_vm2 = vcmp.eq.s32.totalorder %v5060_v31, %v656_v35  ;;  %2711 = vperm.xlu1 %4680, %v3770_v32   ;;  %2708 = vperm.xlu0 %4679, %v3769_v33   ;;  %vm704_vm3 = vcmp.eq.s32.totalorder %v5060_v31, %v662_v34 }
  0xc5   : > { %v3513_v37 = vsel %vm702_vm2, 1.0, %v4710_v36  ;;  %v3515_v43 = vsel %vm704_vm3, 1.0, %v4710_v36 }
  0xc6   : > { %4090 = vmatprep.mubr.msk.f32.mxu1 %vm750_vm1, %v3513_v37 }
  0xc7   : > { %v665_v41 = vpop.permute.xlu1 %664  ;;  %v659_v42 = vpop.permute.xlu0 %658 }
  0xc8   : > { %vm703_vm4 = vcmp.eq.s32.totalorder %v5060_v31, %v659_v42  ;;  %2717 = vperm.xlu1 %4680, %v3772_v38   ;;  %2714 = vperm.xlu0 %4679, %v3771_v39   ;;  %vm705_vm5 = vcmp.eq.s32.totalorder %v5060_v31, %v665_v41 }
  0xc9   : > { %v3514_v44 = vsel %vm703_vm4, 1.0, %v4710_v36  ;;  %v3516_v49 = vsel %vm705_vm5, 1.0, %v4710_v36 }
  0xca   : > { %4091 = vmatmul.mubr.msk.f32.vlgmr.msra.gmra.mrb[0].mxu1 %vm750_vm1, %v3514_v44 }
  0xcb   : > { %4476 = vmatpush3.bf16.msra.mxu1 %v4963_v20  ;;  %v671_v47 = vpop.permute.xlu1 %670  ;;  %4093 = vmatprep.mubr.msk.f32.mxu1 %vm750_vm1, %v3515_v43  ;;  %v668_v48 = vpop.permute.xlu0 %667 }
  0xcc   : > { %vm706_vm6 = vcmp.eq.s32.totalorder %v5060_v31, %v668_v48  ;;  %2723 = vperm.xlu1 %4680, %v3774_v45   ;;  %2720 = vperm.xlu0 %4679, %v3773_v46   ;;  %vm707_vm7 = vcmp.eq.s32.totalorder %v5060_v31, %v671_v47 }
  0xcd   : > { %v3517_v50 = vsel %vm706_vm6, 1.0, %v4710_v36  ;;  %4478 = vmatprep.subr.bf16.mxu1 %v4968_v22  ;;  %v3518_v55 = vsel %vm707_vm7, 1.0, %v4710_v36 }
  0xce   : > { %4094 = vmatmul.mubr.msk.f32.gmra.mrb[2].mxu1 %vm750_vm1, %v3516_v49 }
  0xcf   : > { %v677_v53 = vpop.permute.xlu1 %676  ;;  %4096 = vmatprep.mubr.msk.f32.mxu1 %vm750_vm1, %v3517_v50  ;;  %v674_v54 = vpop.permute.xlu0 %673  ;;  %4480 = vmatpush3.bf16.msra.mxu1 %v4968_v22 }
  0xd0   : > { %vm708_vm8 = vcmp.eq.s32.totalorder %v5060_v31, %v674_v54  ;;  %2729 = vperm.xlu1 %4680, %v3776_v51   ;;  %2726 = vperm.xlu0 %4679, %v3775_v52   ;;  %vm709_vm9 = vcmp.eq.s32.totalorder %v5060_v31, %v677_v53 }
  0xd1   : > { %v3519_v56 = vsel %vm708_vm8, 1.0, %v4710_v36  ;;  %4482 = vmatprep.subr.bf16.mxu1 %v4985_v29  ;;  %v3520_v61 = vsel %vm709_vm9, 1.0, %v4710_v36 }
  0xd2   : > { %4097 = vmatmul.mubr.msk.f32.gmra.mrb[4].mxu1 %vm750_vm1, %v3518_v55 }
  0xd3   : > { %v683_v59 = vpop.permute.xlu1 %682  ;;  %4099 = vmatprep.mubr.msk.f32.mxu1 %vm750_vm1, %v3519_v56  ;;  %v680_v60 = vpop.permute.xlu0 %679  ;;  %4484 = vmatpush3.bf16.msra.mxu1 %v4985_v29 }
  0xd4   : > { %vm710_vm10 = vcmp.eq.s32.totalorder %v5060_v31, %v680_v60  ;;  %2735 = vperm.xlu1 %4680, %v3778_v57   ;;  %2732 = vperm.xlu0 %4679, %v3777_v58   ;;  %vm711_vm11 = vcmp.eq.s32.totalorder %v5060_v31, %v683_v59 }
  0xd5   : > { %v3521_v62 = vsel %vm710_vm10, 1.0, %v4710_v36  ;;  %4126 = vmatprep.subr.msk.mxu1 %vm799_vm0, %v5003_v40  ;;  %v3522_v3 = vsel %vm711_vm11, 1.0, %v4710_v36 }
  0xd6   : > { %4100 = vmatmul.mubr.msk.f32.gmra.mrb[6].mxu1 %vm750_vm1, %v3520_v61 }
  0xd7   : > { %v689_v1 = vpop.permute.xlu1 %688  ;;  %4102 = vmatprep.mubr.msk.f32.mxu1 %vm750_vm1, %v3521_v62  ;;  %v686_v2 = vpop.permute.xlu0 %685  ;;  %4127 = vmatpush3.msk.msra.mxu1 %vm799_vm0, %v5003_v40 }
  0xd8   : > { %vm712_vm12 = vcmp.eq.s32.totalorder %v5060_v31, %v686_v2  ;;  %2741 = vperm.xlu1 %4680, %v3780_v63   ;;  %2738 = vperm.xlu0 %4679, %v3779_v0   ;;  %vm713_vm13 = vcmp.eq.s32.totalorder %v5060_v31, %v689_v1 }
  0xd9   : > { %v3523_v4 = vsel %vm712_vm12, 1.0, %v4710_v36  ;;  %4502 = vmatprep.subr.bf16.mxu1 %v4963_v20  ;;  %v3524_v9 = vsel %vm713_vm13, 1.0, %v4710_v36 }
  0xda   : > { %4103 = vmatmul.mubr.msk.f32.gmra.mrb[8].mxu1 %vm750_vm1, %v3522_v3 }
  0xdb   : > { %v695_v7 = vpop.permute.xlu1 %694  ;;  %4105 = vmatprep.mubr.msk.f32.mxu1 %vm750_vm1, %v3523_v4  ;;  %v692_v8 = vpop.permute.xlu0 %691 }
  0xdc   : > { %vm714_vm14 = vcmp.eq.s32.totalorder %v5060_v31, %v692_v8  ;;  %2747 = vperm.xlu1 %4680, %v3782_v5   ;;  %2744 = vperm.xlu0 %4679, %v3781_v6   ;;  %vm715_vm15 = vcmp.eq.s32.totalorder %v5060_v31, %v695_v7 }
  0xdd   : > { %v3525_v10 = vsel %vm714_vm14, 1.0, %v4710_v36  ;;  %v3526_v15 = vsel %vm715_vm15, 1.0, %v4710_v36 }
  0xde   : > { %4106 = vmatmul.mubr.msk.f32.gmra.mrb[10].mxu1 %vm750_vm1, %v3524_v9 }
  0xdf   : > { %v701_v13 = vpop.permute.xlu1 %700  ;;  %4108 = vmatprep.mubr.msk.f32.mxu1 %vm750_vm1, %v3525_v10  ;;  %v698_v14 = vpop.permute.xlu0 %697 }
  0xe0   : > { %vm716_vm2 = vcmp.eq.s32.totalorder %v5060_v31, %v698_v14  ;;  %2753 = vperm.xlu1 %4680, %v3784_v11   ;;  %2750 = vperm.xlu0 %4679, %v3783_v12   ;;  %vm717_vm3 = vcmp.eq.s32.totalorder %v5060_v31, %v701_v13 }
  0xe1   : > { %v3527_v16 = vsel %vm716_vm2, 1.0, %v4710_v36  ;;  %v3528_v19 = vsel %vm717_vm3, 1.0, %v4710_v36 }
  0xe2   : > { %4109 = vmatmul.mubr.msk.f32.gmra.mrb[12].mxu1 %vm750_vm1, %v3526_v15 }
  0xe3   : > { %v974_v17 = vpop.permute.xlu1 %973  ;;  %4111 = vmatprep.mubr.msk.f32.mxu1 %vm750_vm1, %v3527_v16  ;;  %v971_v18 = vpop.permute.xlu0 %970 }
  0xe4   : > { %vm1017_vm4 = vcmp.eq.s32.totalorder %v5060_v31, %v971_v18  ;;  %vm1018_vm5 = vcmp.eq.s32.totalorder %v5060_v31, %v974_v17 }
  0xe5   : > { %v3562_v21 = vsel %vm1017_vm4, 1.0, %v4710_v36  ;;  %v3563_v25 = vsel %vm1018_vm5, 1.0, %v4710_v36 }
  0xe6   : > { %4112 = vmatmul.mubr.msk.f32.gmra.mrb[14].mxu1 %vm750_vm1, %v3528_v19 }
  0xe7   : > { %v980_v23 = vpop.permute.xlu1 %979  ;;  %4128 = vmatprep.mubr.msk.f32.mxu1 %vm750_vm1, %v3562_v21  ;;  %v977_v24 = vpop.permute.xlu0 %976 }
  0xe8   : > { %vm1019_vm6 = vcmp.eq.s32.totalorder %v5060_v31, %v977_v24  ;;  %vm1020_vm7 = vcmp.eq.s32.totalorder %v5060_v31, %v980_v23 }
  0xe9   : > { %v3564_v26 = vsel %vm1019_vm6, 1.0, %v4710_v36  ;;  %v3565_v30 = vsel %vm1020_vm7, 1.0, %v4710_v36 }
  0xea   : > { %4129 = vmatmul.mubr.msk.f32.vlgmr.msra.gmra.mrb[16].mxu1 %vm750_vm1, %v3563_v25 }
  0xeb   : > { %v986_v27 = vpop.permute.xlu1 %985  ;;  %4131 = vmatprep.mubr.msk.f32.mxu1 %vm750_vm1, %v3564_v26  ;;  %v983_v28 = vpop.permute.xlu0 %982  ;;  %4504 = vmatpush3.bf16.msra.mxu1 %v4963_v20 }
  0xec   : > { %vm1021_vm8 = vcmp.eq.s32.totalorder %v5060_v31, %v983_v28  ;;  %4506 = vmatprep.subr.bf16.mxu1 %v4968_v22  ;;  %vm1022_vm9 = vcmp.eq.s32.totalorder %v5060_v31, %v986_v27 }
  0xed   : > { %v3566_v32 = vsel %vm1021_vm8, 1.0, %v4710_v36  ;;  %v3567_v35 = vsel %vm1022_vm9, 1.0, %v4710_v36 }
  0xee   : > { %4132 = vmatmul.mubr.msk.f32.gmra.mrb[18].mxu1 %vm750_vm1, %v3565_v30 }
  0xef   : > { %v992_v33 = vpop.permute.xlu1 %991  ;;  %4134 = vmatprep.mubr.msk.f32.mxu1 %vm750_vm1, %v3566_v32  ;;  %v989_v34 = vpop.permute.xlu0 %988  ;;  %4508 = vmatpush3.bf16.msra.mxu1 %v4968_v22 }
  0xf0   : > { %vm1023_vm10 = vcmp.eq.s32.totalorder %v5060_v31, %v989_v34  ;;  %4510 = vmatprep.subr.bf16.mxu1 %v4985_v29  ;;  %vm1024_vm11 = vcmp.eq.s32.totalorder %v5060_v31, %v992_v33 }
  0xf1   : > { %v3568_v37 = vsel %vm1023_vm10, 1.0, %v4710_v36  ;;  %v3569_v41 = vsel %vm1024_vm11, 1.0, %v4710_v36 }
  0xf2   : > { %4135 = vmatmul.mubr.msk.f32.gmra.mrb[20].mxu1 %vm750_vm1, %v3567_v35 }
  0xf3   : > { %v998_v38 = vpop.permute.xlu1 %997  ;;  %4137 = vmatprep.mubr.msk.f32.mxu1 %vm750_vm1, %v3568_v37  ;;  %v995_v39 = vpop.permute.xlu0 %994  ;;  %4512 = vmatpush3.bf16.msra.mxu1 %v4985_v29 }
  0xf4   : > { %vm1025_vm12 = vcmp.eq.s32.totalorder %v5060_v31, %v995_v39  ;;  %4228 = vmatprep.subr.msk.mxu1 %vm799_vm0, %v5003_v40  ;;  %vm1026_vm13 = vcmp.eq.s32.totalorder %v5060_v31, %v998_v38 }
  0xf5   : > { %v3570_v42 = vsel %vm1025_vm12, 1.0, %v4710_v36  ;;  %v3571_v45 = vsel %vm1026_vm13, 1.0, %v4710_v36 }
  0xf6   : > { %4138 = vmatmul.mubr.msk.f32.gmra.mrb[22].mxu1 %vm750_vm1, %v3569_v41 }
  0xf7   : > { %v1004_v43 = vpop.permute.xlu1 %1003  ;;  %4140 = vmatprep.mubr.msk.f32.mxu1 %vm750_vm1, %v3570_v42  ;;  %v1001_v44 = vpop.permute.xlu0 %1000  ;;  %4229 = vmatpush3.msk.msra.mxu1 %vm799_vm0, %v5003_v40 }
  0xf8   : > { %vm1027_vm14 = vcmp.eq.s32.totalorder %v5060_v31, %v1001_v44  ;;  %4522 = vmatprep.subr.bf16.mxu1 %v4963_v20  ;;  %vm1028_vm15 = vcmp.eq.s32.totalorder %v5060_v31, %v1004_v43 }
  0xf9   : > { %v3572_v46 = vsel %vm1027_vm14, 1.0, %v4710_v36  ;;  %v3573_v49 = vsel %vm1028_vm15, 1.0, %v4710_v36 }
  0xfa   : > { %4141 = vmatmul.mubr.msk.f32.gmra.mrb[24].mxu1 %vm750_vm1, %v3571_v45 }
  0xfb   : > { %v1010_v47 = vpop.permute.xlu1 %1009  ;;  %4143 = vmatprep.mubr.msk.f32.mxu1 %vm750_vm1, %v3572_v46  ;;  %v1007_v48 = vpop.permute.xlu0 %1006 }
  0xfc   : > { %vm1029_vm2 = vcmp.eq.s32.totalorder %v5060_v31, %v1007_v48  ;;  %vm1030_vm3 = vcmp.eq.s32.totalorder %v5060_v31, %v1010_v47  ;;  %v3595_v47 = vld [vmem:[%s5664_s2 + $0x20] sm:$0xff]  ;;  %v3596_v48 = vld [vmem:[%s5664_s2 + $0x28] sm:$0xff] }
  0xfd   : > { %v3574_v50 = vsel %vm1029_vm2, 1.0, %v4710_v36  ;;  %v3575_v53 = vsel %vm1030_vm3, 1.0, %v4710_v36 }
  0xfe   : > { %4144 = vmatmul.mubr.msk.f32.gmra.mrb[26].mxu1 %vm750_vm1, %v3573_v49 }
  0xff   : > { %v1016_v51 = vpop.permute.xlu1 %1015  ;;  %4146 = vmatprep.mubr.msk.f32.mxu1 %vm750_vm1, %v3574_v50  ;;  %v1013_v52 = vpop.permute.xlu0 %1012 }
 0x100   : > { %vm1031_vm4 = vcmp.eq.s32.totalorder %v5060_v31, %v1013_v52  ;;  %vm1032_vm5 = vcmp.eq.s32.totalorder %v5060_v31, %v1016_v51 }
 0x101   : > { %v3576_v54 = vsel %vm1031_vm4, 1.0, %v4710_v36  ;;  %v3577_v57 = vsel %vm1032_vm5, 1.0, %v4710_v36 }
 0x102   : > { %4147 = vmatmul.mubr.msk.f32.gmra.mrb[28].mxu1 %vm750_vm1, %v3575_v53  ;;  %v3597_v53 = vld [vmem:[%s5664_s2 + $0x30] sm:$0xff] }
 0x103   : > { %v1672_v55 = vpop.permute.xlu1 %1671  ;;  %4149 = vmatprep.mubr.msk.f32.mxu1 %vm750_vm1, %v3576_v54  ;;  %v1669_v56 = vpop.permute.xlu0 %1668  ;;  %v3598_v54 = vld [vmem:[%s5664_s2 + $0x38] sm:$0xff] }
 0x104   : > { %vm1715_vm6 = vcmp.eq.s32.totalorder %v5060_v31, %v1669_v56  ;;  %vm1716_vm7 = vcmp.eq.s32.totalorder %v5060_v31, %v1672_v55 }
 0x105   : > { %v3647_v58 = vsel %vm1715_vm6, 1.0, %v4710_v36  ;;  %v3648_v61 = vsel %vm1716_vm7, 1.0, %v4710_v36 }
 0x106   : > { %4150 = vmatmul.mubr.msk.f32.gmra.mrb[30].mxu1 %vm750_vm1, %v3577_v57 }
 0x107   : > { %v1678_v59 = vpop.permute.xlu1 %1677  ;;  %4230 = vmatprep.mubr.msk.f32.mxu1 %vm750_vm1, %v3647_v58  ;;  %v1675_v60 = vpop.permute.xlu0 %1674 }
 0x108   : > { %vm1717_vm8 = vcmp.eq.s32.totalorder %v5060_v31, %v1675_v60  ;;  %vm1718_vm9 = vcmp.eq.s32.totalorder %v5060_v31, %v1678_v59 }
 0x109   : > { %v3649_v62 = vsel %vm1717_vm8, 1.0, %v4710_v36  ;;  %v3650_v1 = vsel %vm1718_vm9, 1.0, %v4710_v36 }
 0x10a   : > { %4231 = vmatmul.mubr.msk.f32.vlgmr.msra.gmra.mrb[32].mxu1 %vm750_vm1, %v3648_v61  ;;  %v948_v61 = vld [vmem:[%s5664_s2] sm:$0xff] }
 0x10b   : > { %v1684_v63 = vpop.permute.xlu1 %1683  ;;  %4233 = vmatprep.mubr.msk.f32.mxu1 %vm750_vm1, %v3649_v62  ;;  %v1681_v0 = vpop.permute.xlu0 %1680  ;;  %4524 = vmatpush3.bf16.msra.mxu1 %v4963_v20  ;;  %v949_v62 = vld [vmem:[%s5664_s2 + $0x8] sm:$0xff] }
 0x10c   : > { %vm1719_vm10 = vcmp.eq.s32.totalorder %v5060_v31, %v1681_v0  ;;  %4526 = vmatprep.subr.bf16.mxu1 %v4968_v22  ;;  %vm1720_vm11 = vcmp.eq.s32.totalorder %v5060_v31, %v1684_v63  ;;  %v5320_v63 = vpack.c.bf16 %v949_v62, %v948_v61 }
 0x10d   : > { %v3651_v2 = vsel %vm1719_vm10, 1.0, %v4710_v36  ;;  %v3652_v5 = vsel %vm1720_vm11, 1.0, %v4710_v36 }
 0x10e   : > { %4234 = vmatmul.mubr.msk.f32.gmra.mrb[34].mxu1 %vm750_vm1, %v3650_v1 }
 0x10f   : > { %v1690_v3 = vpop.permute.xlu1 %1689  ;;  %4236 = vmatprep.mubr.msk.f32.mxu1 %vm750_vm1, %v3651_v2  ;;  %v1687_v4 = vpop.permute.xlu0 %1686  ;;  %4528 = vmatpush3.bf16.msra.mxu1 %v4968_v22 }
 0x110   : > { %vm1721_vm12 = vcmp.eq.s32.totalorder %v5060_v31, %v1687_v4  ;;  %4530 = vmatprep.subr.bf16.mxu1 %v4985_v29  ;;  %vm1722_vm13 = vcmp.eq.s32.totalorder %v5060_v31, %v1690_v3 }
 0x111   : > { %v3653_v6 = vsel %vm1721_vm12, 1.0, %v4710_v36  ;;  %v3654_v9 = vsel %vm1722_vm13, 1.0, %v4710_v36 }
 0x112   : > { %4237 = vmatmul.mubr.msk.f32.gmra.mrb[36].mxu1 %vm750_vm1, %v3652_v5 }
 0x113   : > { %v1696_v7 = vpop.permute.xlu1 %1695  ;;  %4239 = vmatprep.mubr.msk.f32.mxu1 %vm750_vm1, %v3653_v6  ;;  %v1693_v8 = vpop.permute.xlu0 %1692  ;;  %4532 = vmatpush3.bf16.msra.mxu1 %v4985_v29 }
 0x114   : > { %vm1723_vm14 = vcmp.eq.s32.totalorder %v5060_v31, %v1693_v8  ;;  %4298 = vmatprep.subr.msk.mxu1 %vm799_vm0, %v5003_v40  ;;  %vm1724_vm15 = vcmp.eq.s32.totalorder %v5060_v31, %v1696_v7 }
 0x115   : > { %v3655_v10 = vsel %vm1723_vm14, 1.0, %v4710_v36  ;;  %v3656_v13 = vsel %vm1724_vm15, 1.0, %v4710_v36 }
 0x116   : > { %4240 = vmatmul.mubr.msk.f32.gmra.mrb[38].mxu1 %vm750_vm1, %v3654_v9 }
 0x117   : > { %v1702_v11 = vpop.permute.xlu1 %1701  ;;  %4242 = vmatprep.mubr.msk.f32.mxu1 %vm750_vm1, %v3655_v10  ;;  %v1699_v12 = vpop.permute.xlu0 %1698  ;;  %4299 = vmatpush3.msk.msra.mxu1 %vm799_vm0, %v5003_v40 }
 0x118   : > { %vm1725_vm2 = vcmp.eq.s32.totalorder %v5060_v31, %v1699_v12  ;;  %4542 = vmatprep.subr.bf16.mxu1 %v4963_v20  ;;  %vm1726_vm3 = vcmp.eq.s32.totalorder %v5060_v31, %v1702_v11 }
 0x119   : > { %v3657_v14 = vsel %vm1725_vm2, 1.0, %v4710_v36  ;;  %v3658_v17 = vsel %vm1726_vm3, 1.0, %v4710_v36 }
 0x11a   : > { %4243 = vmatmul.mubr.msk.f32.gmra.mrb[40].mxu1 %vm750_vm1, %v3656_v13 }
 0x11b   : > { %v1708_v15 = vpop.permute.xlu1 %1707  ;;  %4245 = vmatprep.mubr.msk.f32.mxu1 %vm750_vm1, %v3657_v14  ;;  %v1705_v16 = vpop.permute.xlu0 %1704 }
 0x11c   : > { %vm1727_vm4 = vcmp.eq.s32.totalorder %v5060_v31, %v1705_v16  ;;  %vm1728_vm5 = vcmp.eq.s32.totalorder %v5060_v31, %v1708_v15 }
 0x11d   : > { %v3659_v18 = vsel %vm1727_vm4, 1.0, %v4710_v36  ;;  %v3660_v23 = vsel %vm1728_vm5, 1.0, %v4710_v36 }
 0x11e   : > { %4246 = vmatmul.mubr.msk.f32.gmra.mrb[42].mxu1 %vm750_vm1, %v3658_v17 }
 0x11f   : > { %v1714_v19 = vpop.permute.xlu1 %1713  ;;  %4248 = vmatprep.mubr.msk.f32.mxu1 %vm750_vm1, %v3659_v18  ;;  %v1711_v21 = vpop.permute.xlu0 %1710 }
 0x120   : > { %vm1729_vm6 = vcmp.eq.s32.totalorder %v5060_v31, %v1711_v21  ;;  %vm1730_vm7 = vcmp.eq.s32.totalorder %v5060_v31, %v1714_v19 }
 0x121   : > { %v3661_v24 = vsel %vm1729_vm6, 1.0, %v4710_v36  ;;  %v3662_v27 = vsel %vm1730_vm7, 1.0, %v4710_v36 }
 0x122   : > { %4249 = vmatmul.mubr.msk.f32.gmra.mrb[44].mxu1 %vm750_vm1, %v3660_v23 }
 0x123   : > { %v2192_v25 = vpop.permute.xlu1 %2191  ;;  %4251 = vmatprep.mubr.msk.f32.mxu1 %vm750_vm1, %v3661_v24  ;;  %v2189_v26 = vpop.permute.xlu0 %2188 }
 0x124   : > { %vm2235_vm8 = vcmp.eq.s32.totalorder %v5060_v31, %v2189_v26  ;;  %vm2236_vm9 = vcmp.eq.s32.totalorder %v5060_v31, %v2192_v25 }
 0x125   : > { %v3716_v28 = vsel %vm2235_vm8, 1.0, %v4710_v36  ;;  %v3717_v33 = vsel %vm2236_vm9, 1.0, %v4710_v36 }
 0x126   : > { %4252 = vmatmul.mubr.msk.f32.gmra.mrb[46].mxu1 %vm750_vm1, %v3662_v27 }
 0x127   : > { %v2198_v30 = vpop.permute.xlu1 %2197  ;;  %4300 = vmatprep.mubr.msk.f32.mxu1 %vm750_vm1, %v3716_v28  ;;  %v2195_v32 = vpop.permute.xlu0 %2194 }
 0x128   : > { %vm2237_vm10 = vcmp.eq.s32.totalorder %v5060_v31, %v2195_v32  ;;  %vm2238_vm11 = vcmp.eq.s32.totalorder %v5060_v31, %v2198_v30 }
 0x129   : > { %v3718_v34 = vsel %vm2237_vm10, 1.0, %v4710_v36  ;;  %v3719_v38 = vsel %vm2238_vm11, 1.0, %v4710_v36 }
 0x12a   : > { %4301 = vmatmul.mubr.msk.f32.vlgmr.msra.gmra.mrb[48].mxu1 %vm750_vm1, %v3717_v33 }
 0x12b   : > { %v2204_v35 = vpop.permute.xlu1 %2203  ;;  %4303 = vmatprep.mubr.msk.f32.mxu1 %vm750_vm1, %v3718_v34  ;;  %v2201_v37 = vpop.permute.xlu0 %2200  ;;  %4544 = vmatpush3.bf16.msra.mxu1 %v4963_v20 }
 0x12c   : > { %vm2239_vm12 = vcmp.eq.s32.totalorder %v5060_v31, %v2201_v37  ;;  %4546 = vmatprep.subr.bf16.mxu1 %v4968_v22  ;;  %vm2240_vm13 = vcmp.eq.s32.totalorder %v5060_v31, %v2204_v35 }
 0x12d   : > { %v3720_v39 = vsel %vm2239_vm12, 1.0, %v4710_v36  ;;  %v3721_v20 = vsel %vm2240_vm13, 1.0, %v4710_v36 }
 0x12e   : > { %4304 = vmatmul.mubr.msk.f32.gmra.mrb[50].mxu1 %vm750_vm1, %v3719_v38 }
 0x12f   : > { %v2210_v41 = vpop.permute.xlu1 %2209  ;;  %4306 = vmatprep.mubr.msk.f32.mxu1 %vm750_vm1, %v3720_v39  ;;  %v2207_v42 = vpop.permute.xlu0 %2206  ;;  %4548 = vmatpush3.bf16.msra.mxu1 %v4968_v22 }
 0x130   : > { %vm2241_vm14 = vcmp.eq.s32.totalorder %v5060_v31, %v2207_v42  ;;  %4550 = vmatprep.subr.bf16.mxu1 %v4985_v29  ;;  %vm2242_vm15 = vcmp.eq.s32.totalorder %v5060_v31, %v2210_v41 }
 0x131   : > { %v3722_v43 = vsel %vm2241_vm14, 1.0, %v4710_v36  ;;  %v3723_v22 = vsel %vm2242_vm15, 1.0, %v4710_v36 }
 0x132   : > { %4307 = vmatmul.mubr.msk.f32.gmra.mrb[52].mxu1 %vm750_vm1, %v3721_v20 }
 0x133   : > { %v2216_v44 = vpop.permute.xlu1 %2215  ;;  %4309 = vmatprep.mubr.msk.f32.mxu1 %vm750_vm1, %v3722_v43  ;;  %v2213_v45 = vpop.permute.xlu0 %2212  ;;  %4552 = vmatpush3.bf16.msra.mxu1 %v4985_v29  ;;  %v4485_v29 = vpack.c.bf16 %v3596_v48, %v3595_v47 }
 0x134   : > { %vm2243_vm2 = vcmp.eq.s32.totalorder %v5060_v31, %v2213_v45  ;;  %4368 = vmatprep.subr.msk.mxu1 %vm799_vm0, %v5003_v40  ;;  %vm2244_vm3 = vcmp.eq.s32.totalorder %v5060_v31, %v2216_v44 }
 0x135   : > { %v3724_v46 = vsel %vm2243_vm2, 1.0, %v4710_v36  ;;  %4486 = vmatprep.subr.bf16.mxu0 %v4485_v29  ;;  %v3725_v51 = vsel %vm2244_vm3, 1.0, %v4710_v36 }
 0x136   : > { %4310 = vmatmul.mubr.msk.f32.gmra.mrb[54].mxu1 %vm750_vm1, %v3723_v22  ;;  %4488 = vmatpush3.bf16.msra.mxu0 %v4485_v29 }
 0x137   : > { %v2222_v49 = vpop.permute.xlu1 %2221  ;;  %4312 = vmatprep.mubr.msk.f32.mxu1 %vm750_vm1, %v3724_v46  ;;  %v2219_v50 = vpop.permute.xlu0 %2218  ;;  %4369 = vmatpush3.msk.msra.mxu1 %vm799_vm0, %v5003_v40  ;;  %v4489_v40 = vpack.c.bf16 %v3598_v54, %v3597_v53  ;;  %v950_v53 = vld [vmem:[%s5664_s2 + $0x10] sm:$0xff]  ;;  %v951_v54 = vld [vmem:[%s5664_s2 + $0x18] sm:$0xff] }
 0x138   : > { %vm2245_vm4 = vcmp.eq.s32.totalorder %v5060_v31, %v2219_v50  ;;  %vm2246_vm5 = vcmp.eq.s32.totalorder %v5060_v31, %v2222_v49 }
 0x139   : > { %v3726_v52 = vsel %vm2245_vm4, 1.0, %v4710_v36  ;;  %4490 = vmatprep.subr.bf16.mxu0 %v4489_v40  ;;  %v3727_v57 = vsel %vm2246_vm5, 1.0, %v4710_v36 }
 0x13a   : > { %4313 = vmatmul.mubr.msk.f32.gmra.mrb[56].mxu1 %vm750_vm1, %v3725_v51  ;;  %4492 = vmatpush3.bf16.msra.mxu0 %v4489_v40 }
 0x13b   : > { %v2228_v55 = vpop.permute.xlu1 %2227  ;;  %4315 = vmatprep.mubr.msk.f32.mxu1 %vm750_vm1, %v3726_v52  ;;  %v2225_v56 = vpop.permute.xlu0 %2224  ;;  %4494 = vmatprep.subr.bf16.mxu0 %v5320_v63 }
 0x13c   : > { %vm2247_vm0 = vcmp.eq.s32.totalorder %v5060_v31, %v2225_v56  ;;  %vm2248_vm6 = vcmp.eq.s32.totalorder %v5060_v31, %v2228_v55  ;;  %v4497_v56 = vpack.c.bf16 %v951_v54, %v950_v53 }
 0x13d   : > { %v3728_v58 = vsel %vm2247_vm0, 1.0, %v4710_v36  ;;  %v3729_v0 = vsel %vm2248_vm6, 1.0, %v4710_v36 }
 0x13e   : > { %4316 = vmatmul.mubr.msk.f32.gmra.mrb[58].mxu1 %vm750_vm1, %v3727_v57  ;;  %v3680_v57 = vld [vmem:[%s5664_s2 + $0x40] sm:$0xff] }
 0x13f   : > { %v2234_v59 = vpop.permute.xlu1 %2233  ;;  %4318 = vmatprep.mubr.msk.f32.mxu1 %vm750_vm1, %v3728_v58  ;;  %v2231_v60 = vpop.permute.xlu0 %2230  ;;  %v3681_v58 = vld [vmem:[%s5664_s2 + $0x48] sm:$0xff] }
 0x140   : > { %vm2249_vm7 = vcmp.eq.s32.totalorder %v5060_v31, %v2231_v60  ;;  %vm2250_vm8 = vcmp.eq.s32.totalorder %v5060_v31, %v2234_v59  ;;  %v4513_v61 = vpack.c.bf16 %v3681_v58, %v3680_v57 }
 0x141   : > { %v3730_v1 = vsel %vm2249_vm7, 1.0, %v4710_v36  ;;  %v3731_v4 = vsel %vm2250_vm8, 1.0, %v4710_v36 }
 0x142   : > { %4319 = vmatmul.mubr.msk.f32.gmra.mrb[60].mxu1 %vm750_vm1, %v3729_v0 }
 0x143   : > { %v2712_v2 = vpop.permute.xlu1 %2711  ;;  %4321 = vmatprep.mubr.msk.f32.mxu1 %vm750_vm1, %v3730_v1  ;;  %v2709_v3 = vpop.permute.xlu0 %2708 }
 0x144   : > { %vm2755_vm9 = vcmp.eq.s32.totalorder %v5060_v31, %v2709_v3  ;;  %vm2756_vm10 = vcmp.eq.s32.totalorder %v5060_v31, %v2712_v2 }
 0x145   : > { %v3785_v5 = vsel %vm2755_vm9, 1.0, %v4710_v36  ;;  %v3786_v8 = vsel %vm2756_vm10, 1.0, %v4710_v36  ;;  %vm4712_vm10 = vmmov 0  }
 0x146   : > { %4322 = vmatmul.mubr.msk.f32.gmra.mrb[62].mxu1 %vm750_vm1, %v3731_v4 }
 0x147   : > { %v2718_v6 = vpop.permute.xlu1 %2717  ;;  %4370 = vmatprep.mubr.msk.f32.mxu1 %vm750_vm1, %v3785_v5  ;;  %v2715_v7 = vpop.permute.xlu0 %2714 }
 0x148   : > { %vm2757_vm11 = vcmp.eq.s32.totalorder %v5060_v31, %v2715_v7  ;;  %vm2758_vm12 = vcmp.eq.s32.totalorder %v5060_v31, %v2718_v6 }
 0x149   : > { %v3787_v9 = vsel %vm2757_vm11, 1.0, %v4710_v36  ;;  %v3788_v12 = vsel %vm2758_vm12, 1.0, %v4710_v36  ;;  %vm3354_vm11 = vcmask 1041409   ;;  %vm3356_vm12 = vcmask 1042434  }
 0x14a   : > { %4371 = vmatmul.mubr.msk.f32.vlgmr.msra.gmra.mrb[64].mxu1 %vm750_vm1, %v3786_v8 }
 0x14b   : > { %v2724_v10 = vpop.permute.xlu1 %2723  ;;  %4373 = vmatprep.mubr.msk.f32.mxu1 %vm750_vm1, %v3787_v9  ;;  %v2721_v11 = vpop.permute.xlu0 %2720 }
 0x14c   : > { %vm2759_vm13 = vcmp.eq.s32.totalorder %v5060_v31, %v2721_v11  ;;  %vm2760_vm14 = vcmp.eq.s32.totalorder %v5060_v31, %v2724_v10  ;;  %v3682_v10 = vld [vmem:[%s5664_s2 + $0x50] sm:$0xff]  ;;  %v3683_v11 = vld [vmem:[%s5664_s2 + $0x58] sm:$0xff] }
 0x14d   : > { %v3789_v13 = vsel %vm2759_vm13, 1.0, %v4710_v36  ;;  %v3790_v16 = vsel %vm2760_vm14, 1.0, %v4710_v36  ;;  %vm3358_vm13 = vcmask 1043459   ;;  %vm3360_vm14 = vcmask 1044484  }
 0x14e   : > { %4374 = vmatmul.mubr.msk.f32.gmra.mrb[66].mxu1 %vm750_vm1, %v3788_v12 }
 0x14f   : > { %v2730_v14 = vpop.permute.xlu1 %2729  ;;  %4376 = vmatprep.mubr.msk.f32.mxu1 %vm750_vm1, %v3789_v13  ;;  %v2727_v15 = vpop.permute.xlu0 %2726 }
 0x150   : > { %vm2761_vm15 = vcmp.eq.s32.totalorder %v5060_v31, %v2727_v15  ;;  %vm2762_vm2 = vcmp.eq.s32.totalorder %v5060_v31, %v2730_v14  ;;  %v4517_v14 = vpack.c.bf16 %v3683_v11, %v3682_v10  ;;  %v3749_v15 = vld [vmem:[%s5664_s2 + $0x60] sm:$0xff]  ;;  %v3324_v11 = vld [vmem:[%s5667_s5 + $0x8] sm:$0xff] }
 0x151   : > { %v3791_v17 = vsel %vm2761_vm15, 1.0, %v4710_v36  ;;  %v3792_v21 = vsel %vm2762_vm2, 1.0, %v4710_v36  ;;  %v3323_v10 = vld [vmem:[%s5667_s5] sm:$0xff]  ;;  %vm3362_vm15 = vcmask 1045509   ;;  %vm3364_vm2 = vcmask 1046534  }
 0x152   : > { %4377 = vmatmul.mubr.msk.f32.gmra.mrb[68].mxu1 %vm750_vm1, %v3790_v16  ;;  %v3750_v16 = vld [vmem:[%s5664_s2 + $0x68] sm:$0xff] }
 0x153   : > { %v2736_v18 = vpop.permute.xlu1 %2735  ;;  %4379 = vmatprep.mubr.msk.f32.mxu1 %vm750_vm1, %v3791_v17  ;;  %v2733_v19 = vpop.permute.xlu0 %2732 }
 0x154   : > { %vm2763_vm3 = vcmp.eq.s32.totalorder %v5060_v31, %v2733_v19  ;;  %vm2764_vm4 = vcmp.eq.s32.totalorder %v5060_v31, %v2736_v18  ;;  %v4533_v19 = vpack.c.bf16 %v3750_v16, %v3749_v15  ;;  %v3326_v15 = vld [vmem:[%s5667_s5 + $0x18] sm:$0xff] }
 0x155   : > { %v3793_v23 = vsel %vm2763_vm3, 1.0, %v4710_v36  ;;  %v3794_v26 = vsel %vm2764_vm4, 1.0, %v4710_v36  ;;  %vm3366_vm3 = vcmask 1047559  }
 0x156   : > { %4380 = vmatmul.mubr.msk.f32.gmra.mrb[70].mxu1 %vm750_vm1, %v3792_v21 }
 0x157   : > { %v2742_v24 = vpop.permute.xlu1 %2741  ;;  %4382 = vmatprep.mubr.msk.f32.mxu1 %vm750_vm1, %v3793_v23  ;;  %v2739_v25 = vpop.permute.xlu0 %2738 }
 0x158   : > { %vm2765_vm5 = vcmp.eq.s32.totalorder %v5060_v31, %v2739_v25  ;;  %vm2766_vm0 = vcmp.eq.s32.totalorder %v5060_v31, %v2742_v24 }
 0x159   : > { %v3795_v27 = vsel %vm2765_vm5, 1.0, %v4710_v36  ;;  %v3796_v32 = vsel %vm2766_vm0, 1.0, %v4710_v36 }
 0x15a   : > { %4383 = vmatmul.mubr.msk.f32.gmra.mrb[72].mxu1 %vm750_vm1, %v3794_v26 }
 0x15b   : > { %v2748_v28 = vpop.permute.xlu1 %2747  ;;  %4385 = vmatprep.mubr.msk.f32.mxu1 %vm750_vm1, %v3795_v27  ;;  %v2745_v30 = vpop.permute.xlu0 %2744 }
 0x15c   : > { %vm2767_vm6 = vcmp.eq.s32.totalorder %v5060_v31, %v2745_v30  ;;  %vm2768_vm7 = vcmp.eq.s32.totalorder %v5060_v31, %v2748_v28 }
 0x15d   : > { %v3797_v33 = vsel %vm2767_vm6, 1.0, %v4710_v36  ;;  %v3798_v37 = vsel %vm2768_vm7, 1.0, %v4710_v36 }
 0x15e   : > { %4386 = vmatmul.mubr.msk.f32.gmra.mrb[74].mxu1 %vm750_vm1, %v3796_v32 }
 0x15f   : > { %v2754_v34 = vpop.permute.xlu1 %2753  ;;  %4388 = vmatprep.mubr.msk.f32.mxu1 %vm750_vm1, %v3797_v33  ;;  %v2751_v35 = vpop.permute.xlu0 %2750 }
 0x160   : > { %vm2769_vm8 = vcmp.eq.s32.totalorder %v5060_v31, %v2751_v35  ;;  %vm2770_vm9 = vcmp.eq.s32.totalorder %v5060_v31, %v2754_v34 }
 0x161   : > { %v3799_v38 = vsel %vm2769_vm8, 1.0, %v4710_v36  ;;  %v3800_v39 = vsel %vm2770_vm9, 1.0, %v4710_v36 }
 0x162   : > { %4389 = vmatmul.mubr.msk.f32.gmra.mrb[76].mxu1 %vm750_vm1, %v3798_v37  ;;  %v3751_v37 = vld [vmem:[%s5664_s2 + $0x70] sm:$0xff] }
 0x163   : > { %4391 = vmatprep.mubr.msk.f32.mxu1 %vm750_vm1, %v3799_v38  ;;  %v3752_v38 = vld [vmem:[%s5664_s2 + $0x78] sm:$0xff] }
 0x166   : > { %4392 = vmatmul.mubr.msk.f32.gmra.mrb[78].mxu1 %vm750_vm1, %v3800_v39  ;;  %vm1263_vm1 = vcmask 261120  }
 0x19d   : > { %v5378_v41 = vpop.f32.mrb[0].mxu1 }
 0x19e   : > { %v869_v42 = vpop.f32.mrb[1].mxu1 }
 0x1a1   : > { %v5380_v20 = vpop.f32.mrb[2].mxu1 }
 0x1a2   : > { %v5382_v43 = vpop.f32.mrb[3].mxu1 }
 0x1a5   : > { %v5384_v44 = vpop.f32.mrb[4].mxu1 }
 0x1a6   : > { %v5386_v45 = vpop.f32.mrb[5].mxu1 }
 0x1a9   : > { %v5388_v31 = vpop.f32.mrb[6].mxu1 }
 0x1aa   : > { %v5390_v22 = vpop.f32.mrb[7].mxu1 }
 0x1ad   : > { %v5392_v46 = vpop.f32.mrb[8].mxu1 }
 0x1ae   : > { %v5394_v47 = vpop.f32.mrb[9].mxu1 }
 0x1b1   : > { %v5396_v48 = vpop.f32.mrb[10].mxu1 }
 0x1b2   : > { %v5398_v29 = vpop.f32.mrb[11].mxu1 }
 0x1b5   : > { %v5400_v49 = vpop.f32.mrb[12].mxu1 }
 0x1b6   : > { %v5402_v50 = vpop.f32.mrb[13].mxu1 }
 0x1b9   : > { %v5404_v51 = vpop.f32.mrb[14].mxu1 }
 0x1ba   : > { %v5406_v52 = vpop.f32.mrb[15].mxu1 }
 0x1bd   : > { %v4130_v40 = vpop.f32.mrb[16].mxu1 }
 0x1be   : > { %v1179_v55 = vpop.f32.mrb[17].mxu1 }
 0x1bf   : > { %4160 = vmatprep.mubr.msk.f32.mxu0 %vm1263_vm1, %v1179_v55  ;;  %v3820_v55 = vld [vmem:[%s5664_s2 + $0x90] sm:$0xff] }
 0x1c0   : > { %4161 = vmatmul.mubr.msk.f32.vlgmr.msra.gmra.mrb[0].mxu0 %vm1263_vm1, %v4130_v40 }
 0x1c1   : > { %4496 = vmatpush3.bf16.msra.mxu0 %v5320_v63  ;;  %v4133_v59 = vpop.f32.mrb[18].mxu1 }
 0x1c2   : > { %v1189_v60 = vpop.f32.mrb[19].mxu1  ;;  %4498 = vmatprep.subr.bf16.mxu0 %v4497_v56 }
 0x1c3   : > { %4163 = vmatprep.mubr.msk.f32.mxu0 %vm1263_vm1, %v1189_v60 }
 0x1c4   : > { %4164 = vmatmul.mubr.msk.f32.gmra.mrb[2].mxu0 %vm1263_vm1, %v4133_v59 }
 0x1c5   : > { %v4136_v62 = vpop.f32.mrb[20].mxu1  ;;  %4500 = vmatpush3.bf16.msra.mxu0 %v4497_v56  ;;  %v3821_v56 = vld [vmem:[%s5664_s2 + $0x98] sm:$0xff] }
 0x1c6   : > { %v1199_v0 = vpop.f32.mrb[21].mxu1  ;;  %4514 = vmatprep.subr.bf16.mxu0 %v4513_v61  ;;  %v4557_v59 = vpack.c.bf16 %v3821_v56, %v3820_v55 }
 0x1c7   : > { %4166 = vmatprep.mubr.msk.f32.mxu0 %vm1263_vm1, %v1199_v0 }
 0x1c8   : > { %4167 = vmatmul.mubr.msk.f32.gmra.mrb[4].mxu0 %vm1263_vm1, %v4136_v62 }
 0x1c9   : > { %v4139_v1 = vpop.f32.mrb[22].mxu1 }
 0x1ca   : > { %v1209_v2 = vpop.f32.mrb[23].mxu1 }
 0x1cb   : > { %4169 = vmatprep.mubr.msk.f32.mxu0 %vm1263_vm1, %v1209_v2 }
 0x1cc   : > { %4170 = vmatmul.mubr.msk.f32.gmra.mrb[6].mxu0 %vm1263_vm1, %v4139_v1 }
 0x1cd   : > { %v4142_v63 = vpop.f32.mrb[24].mxu1 }
 0x1ce   : > { %v1219_v3 = vpop.f32.mrb[25].mxu1 }
 0x1cf   : > { %4172 = vmatprep.mubr.msk.f32.mxu0 %vm1263_vm1, %v1219_v3 }
 0x1d0   : > { %4173 = vmatmul.mubr.msk.f32.gmra.mrb[8].mxu0 %vm1263_vm1, %v4142_v63 }
 0x1d1   : > { %v4145_v4 = vpop.f32.mrb[26].mxu1 }
 0x1d2   : > { %v1229_v5 = vpop.f32.mrb[27].mxu1 }
 0x1d3   : > { %4175 = vmatprep.mubr.msk.f32.mxu0 %vm1263_vm1, %v1229_v5 }
 0x1d4   : > { %4176 = vmatmul.mubr.msk.f32.gmra.mrb[10].mxu0 %vm1263_vm1, %v4145_v4 }
 0x1d5   : > { %v4148_v6 = vpop.f32.mrb[28].mxu1 }
 0x1d6   : > { %v1239_v7 = vpop.f32.mrb[29].mxu1 }
 0x1d7   : > { %4178 = vmatprep.mubr.msk.f32.mxu0 %vm1263_vm1, %v1239_v7 }
 0x1d8   : > { %4179 = vmatmul.mubr.msk.f32.gmra.mrb[12].mxu0 %vm1263_vm1, %v4148_v6 }
 0x1d9   : > { %v4151_v8 = vpop.f32.mrb[30].mxu1 }
 0x1da   : > { %v1249_v9 = vpop.f32.mrb[31].mxu1 }
 0x1db   : > { %4181 = vmatprep.mubr.msk.f32.mxu0 %vm1263_vm1, %v1249_v9 }
 0x1dc   : > { %4182 = vmatmul.mubr.msk.f32.gmra.mrb[14].mxu0 %vm1263_vm1, %v4151_v8 }
 0x1dd   : > { %4192 = vmatprep.mubr.msk.f32.mxu0 %vm1263_vm1, %v869_v42  ;;  %v4232_v12 = vpop.f32.mrb[32].mxu1  ;;  %v4537_v42 = vpack.c.bf16 %v3752_v38, %v3751_v37  ;;  %v3337_v37 = vld [vmem:[%s5667_s5 + $0x70] sm:$0xff]  ;;  %v3338_v38 = vld [vmem:[%s5667_s5 + $0x78] sm:$0xff] }
 0x1de   : > { %v1877_v13 = vpop.f32.mrb[33].mxu1 }
 0x1e0   : > { %4193 = vmatmul.mubr.msk.f32.vlgmr.msra.gmra.mrb[0].mxu0 %vm1263_vm1, %v5378_v41 }
 0x1e1   : > { %4516 = vmatpush3.bf16.msra.mxu0 %v4513_v61  ;;  %4195 = vmatprep.mubr.msk.f32.mxu0 %vm1263_vm1, %v5382_v43  ;;  %v4235_v17 = vpop.f32.mrb[34].mxu1  ;;  %v3819_v43 = vld [vmem:[%s5664_s2 + $0x88] sm:$0xff] }
 0x1e2   : > { %v1887_v18 = vpop.f32.mrb[35].mxu1  ;;  %4518 = vmatprep.subr.bf16.mxu0 %v4517_v14 }
 0x1e4   : > { %4196 = vmatmul.mubr.msk.f32.gmra.mrb[2].mxu0 %vm1263_vm1, %v5380_v20  ;;  %v3818_v20 = vld [vmem:[%s5664_s2 + $0x80] sm:$0xff] }
 0x1e5   : > { %4198 = vmatprep.mubr.msk.f32.mxu0 %vm1263_vm1, %v5386_v45  ;;  %v4238_v21 = vpop.f32.mrb[36].mxu1  ;;  %4520 = vmatpush3.bf16.msra.mxu0 %v4517_v14  ;;  %v3325_v14 = vld [vmem:[%s5667_s5 + $0x10] sm:$0xff] }
 0x1e6   : > { %v1897_v23 = vpop.f32.mrb[37].mxu1  ;;  %4534 = vmatprep.subr.bf16.mxu0 %v4533_v19  ;;  %v4565_v16 = vpack.c.bf16 %v3326_v15, %v3325_v14 }
 0x1e8   : > { %4199 = vmatmul.mubr.msk.f32.gmra.mrb[4].mxu0 %vm1263_vm1, %v5384_v44 }
 0x1e9   : > { %4201 = vmatprep.mubr.msk.f32.mxu0 %vm1263_vm1, %v5390_v22  ;;  %v4241_v24 = vpop.f32.mrb[38].mxu1 }
 0x1ea   : > { %v1907_v25 = vpop.f32.mrb[39].mxu1 }
 0x1ec   : > { %4202 = vmatmul.mubr.msk.f32.gmra.mrb[6].mxu0 %vm1263_vm1, %v5388_v31  ;;  %v4553_v31 = vpack.c.bf16 %v3819_v43, %v3818_v20 }
 0x1ed   : > { %4204 = vmatprep.mubr.msk.f32.mxu0 %vm1263_vm1, %v5394_v47  ;;  %v4244_v26 = vpop.f32.mrb[40].mxu1 }
 0x1ee   : > { %v1917_v27 = vpop.f32.mrb[41].mxu1 }
 0x1f0   : > { %4205 = vmatmul.mubr.msk.f32.gmra.mrb[8].mxu0 %vm1263_vm1, %v5392_v46 }
 0x1f1   : > { %4207 = vmatprep.mubr.msk.f32.mxu0 %vm1263_vm1, %v5398_v29  ;;  %v4247_v28 = vpop.f32.mrb[42].mxu1 }
 0x1f2   : > { %v1927_v30 = vpop.f32.mrb[43].mxu1 }
 0x1f4   : > { %4208 = vmatmul.mubr.msk.f32.gmra.mrb[10].mxu0 %vm1263_vm1, %v5396_v48 }
 0x1f5   : > { %4210 = vmatprep.mubr.msk.f32.mxu0 %vm1263_vm1, %v5402_v50  ;;  %v4250_v32 = vpop.f32.mrb[44].mxu1 }
 0x1f6   : > { %v1937_v33 = vpop.f32.mrb[45].mxu1 }
 0x1f8   : > { %4211 = vmatmul.mubr.msk.f32.gmra.mrb[12].mxu0 %vm1263_vm1, %v5400_v49 }
 0x1f9   : > { %4213 = vmatprep.mubr.msk.f32.mxu0 %vm1263_vm1, %v5406_v52  ;;  %v4253_v34 = vpop.f32.mrb[46].mxu1 }
 0x1fa   : > { %v1947_v35 = vpop.f32.mrb[47].mxu1 }
 0x1fc   : > { %4214 = vmatmul.mubr.msk.f32.gmra.mrb[14].mxu0 %vm1263_vm1, %v5404_v51 }
 0x1fd   : > { %4262 = vmatprep.mubr.msk.f32.mxu0 %vm1263_vm1, %v1877_v13  ;;  %v4302_v39 = vpop.f32.mrb[48].mxu1  ;;  %v4711_v13 = vmov 0.0|0.0  }
 0x1fe   : > { %v2397_v41 = vpop.f32.mrb[49].mxu1 }
 0x200   : > { %4263 = vmatmul.mubr.msk.f32.vlgmr.msra.gmra.mrb[0].mxu0 %vm1263_vm1, %v4232_v12  ;;  %v4562_v12 = vpack.c.bf16 %v3324_v11, %v3323_v10 }
 0x201   : > { %4536 = vmatpush3.bf16.msra.mxu0 %v4533_v19  ;;  %4265 = vmatprep.mubr.msk.f32.mxu0 %vm1263_vm1, %v1887_v18  ;;  %v4305_v44 = vpop.f32.mrb[50].mxu1  ;;  %v3328_v18 = vld [vmem:[%s5667_s5 + $0x28] sm:$0xff] }
 0x202   : > { %v2407_v45 = vpop.f32.mrb[51].mxu1  ;;  %4538 = vmatprep.subr.bf16.mxu0 %v4537_v42 }
 0x204   : > { %4266 = vmatmul.mubr.msk.f32.gmra.mrb[2].mxu0 %vm1263_vm1, %v4235_v17  ;;  %v3327_v17 = vld [vmem:[%s5667_s5 + $0x20] sm:$0xff] }
 0x205   : > { %4268 = vmatprep.mubr.msk.f32.mxu0 %vm1263_vm1, %v1897_v23  ;;  %v4308_v22 = vpop.f32.mrb[52].mxu1  ;;  %4540 = vmatpush3.bf16.msra.mxu0 %v4537_v42  ;;  %v4568_v19 = vpack.c.bf16 %v3328_v18, %v3327_v17  ;;  %v3330_v23 = vld [vmem:[%s5667_s5 + $0x38] sm:$0xff] }
 0x206   : > { %v2417_v46 = vpop.f32.mrb[53].mxu1  ;;  %4554 = vmatprep.subr.bf16.mxu0 %v4553_v31 }
 0x208   : > { %4269 = vmatmul.mubr.msk.f32.gmra.mrb[4].mxu0 %vm1263_vm1, %v4238_v21  ;;  %v3329_v21 = vld [vmem:[%s5667_s5 + $0x30] sm:$0xff] }
 0x209   : > { %4271 = vmatprep.mubr.msk.f32.mxu0 %vm1263_vm1, %v1907_v25  ;;  %v4311_v47 = vpop.f32.mrb[54].mxu1  ;;  %v3331_v25 = vld [vmem:[%s5667_s5 + $0x40] sm:$0xff] }
 0x20a   : > { %v2427_v48 = vpop.f32.mrb[55].mxu1 }
 0x20c   : > { %4272 = vmatmul.mubr.msk.f32.gmra.mrb[6].mxu0 %vm1263_vm1, %v4241_v24  ;;  %v4571_v24 = vpack.c.bf16 %v3330_v23, %v3329_v21 }
 0x20d   : > { %4274 = vmatprep.mubr.msk.f32.mxu0 %vm1263_vm1, %v1917_v27  ;;  %v4314_v29 = vpop.f32.mrb[56].mxu1 }
 0x20e   : > { %v2437_v49 = vpop.f32.mrb[57].mxu1 }
 0x210   : > { %4275 = vmatmul.mubr.msk.f32.gmra.mrb[8].mxu0 %vm1263_vm1, %v4244_v26  ;;  %v3332_v26 = vld [vmem:[%s5667_s5 + $0x48] sm:$0xff] }
 0x211   : > { %4277 = vmatprep.mubr.msk.f32.mxu0 %vm1263_vm1, %v1927_v30  ;;  %v4317_v50 = vpop.f32.mrb[58].mxu1  ;;  %v4574_v27 = vpack.c.bf16 %v3332_v26, %v3331_v25  ;;  %v3334_v30 = vld [vmem:[%s5667_s5 + $0x58] sm:$0xff] }
 0x212   : > { %v2447_v51 = vpop.f32.mrb[59].mxu1 }
 0x214   : > { %4278 = vmatmul.mubr.msk.f32.gmra.mrb[10].mxu0 %vm1263_vm1, %v4247_v28  ;;  %v3333_v28 = vld [vmem:[%s5667_s5 + $0x50] sm:$0xff] }
 0x215   : > { %4280 = vmatprep.mubr.msk.f32.mxu0 %vm1263_vm1, %v1937_v33  ;;  %v4320_v52 = vpop.f32.mrb[60].mxu1  ;;  %v3335_v33 = vld [vmem:[%s5667_s5 + $0x60] sm:$0xff] }
 0x216   : > { %v2457_v53 = vpop.f32.mrb[61].mxu1 }
 0x218   : > { %4281 = vmatmul.mubr.msk.f32.gmra.mrb[12].mxu0 %vm1263_vm1, %v4250_v32  ;;  %v4577_v32 = vpack.c.bf16 %v3334_v30, %v3333_v28 }
 0x219   : > { %4283 = vmatprep.mubr.msk.f32.mxu0 %vm1263_vm1, %v1947_v35  ;;  %v4323_v54 = vpop.f32.mrb[62].mxu1 }
 0x21a   : > { %v2467_v40 = vpop.f32.mrb[63].mxu1 }
 0x21c   : > { %4284 = vmatmul.mubr.msk.f32.gmra.mrb[14].mxu0 %vm1263_vm1, %v4253_v34  ;;  %v3336_v34 = vld [vmem:[%s5667_s5 + $0x68] sm:$0xff] }
 0x21d   : > { %4332 = vmatprep.mubr.msk.f32.mxu0 %vm1263_vm1, %v2397_v41  ;;  %v4372_v57 = vpop.f32.mrb[64].mxu1  ;;  %v4580_v35 = vpack.c.bf16 %v3336_v34, %v3335_v33  ;;  %v5598_v41 = vld [vmem:[%s5665_s3] ss:$0 sm:$0xff] }
 0x21e   : > { %v2917_v58 = vpop.f32.mrb[65].mxu1 }
 0x220   : > { %4333 = vmatmul.mubr.msk.f32.vlgmr.msra.gmra.mrb[0].mxu0 %vm1263_vm1, %v4302_v39  ;;  %v4583_v39 = vpack.c.bf16 %v3338_v38, %v3337_v37 }
 0x221   : > { %4556 = vmatpush3.bf16.msra.mxu0 %v4553_v31  ;;  %4335 = vmatprep.mubr.msk.f32.mxu0 %vm1263_vm1, %v2407_v45  ;;  %v4375_v60 = vpop.f32.mrb[66].mxu1 }
 0x222   : > { %v2927_v61 = vpop.f32.mrb[67].mxu1  ;;  %4558 = vmatprep.subr.bf16.mxu0 %v4557_v59 }
 0x224   : > { %4336 = vmatmul.mubr.msk.f32.gmra.mrb[2].mxu0 %vm1263_vm1, %v4305_v44  ;;  %v5604_v44 = vld [vmem:[%s5666_s4 + $0x8] sm:$0xff] }
 0x225   : > { %4338 = vmatprep.mubr.msk.f32.mxu0 %vm1263_vm1, %v2417_v46  ;;  %v4378_v62 = vpop.f32.mrb[68].mxu1  ;;  %4560 = vmatpush3.bf16.msra.mxu0 %v4557_v59 }
 0x226   : > { %v2937_v0 = vpop.f32.mrb[69].mxu1  ;;  %4561 = vmatprep.subr.bf16.mxu0 %v4711_v13 }
 0x228   : > { %4339 = vmatmul.mubr.msk.f32.gmra.mrb[4].mxu0 %vm1263_vm1, %v4308_v22 }
 0x229   : > { %4341 = vmatprep.mubr.msk.f32.mxu0 %vm1263_vm1, %v2427_v48  ;;  %v4381_v1 = vpop.f32.mrb[70].mxu1 }
 0x22a   : > { %v2947_v2 = vpop.f32.mrb[71].mxu1 }
 0x22c   : > { %4342 = vmatmul.mubr.msk.f32.gmra.mrb[6].mxu0 %vm1263_vm1, %v4311_v47 }
 0x22d   : > { %4344 = vmatprep.mubr.msk.f32.mxu0 %vm1263_vm1, %v2437_v49  ;;  %v4384_v63 = vpop.f32.mrb[72].mxu1 }
 0x22e   : > { %v2957_v3 = vpop.f32.mrb[73].mxu1 }
 0x230   : > { %4345 = vmatmul.mubr.msk.f32.gmra.mrb[8].mxu0 %vm1263_vm1, %v4314_v29 }
 0x231   : > { %4347 = vmatprep.mubr.msk.f32.mxu0 %vm1263_vm1, %v2447_v51  ;;  %v4387_v4 = vpop.f32.mrb[74].mxu1 }
 0x232   : > { %v2967_v5 = vpop.f32.mrb[75].mxu1 }
 0x234   : > { %4348 = vmatmul.mubr.msk.f32.gmra.mrb[10].mxu0 %vm1263_vm1, %v4317_v50 }
 0x235   : > { %4350 = vmatprep.mubr.msk.f32.mxu0 %vm1263_vm1, %v2457_v53  ;;  %v4390_v6 = vpop.f32.mrb[76].mxu1 }
 0x236   : > { %v2977_v7 = vpop.f32.mrb[77].mxu1 }
 0x238   : > { %4351 = vmatmul.mubr.msk.f32.gmra.mrb[12].mxu0 %vm1263_vm1, %v4320_v52 }
 0x239   : > { %4353 = vmatprep.mubr.msk.f32.mxu0 %vm1263_vm1, %v2467_v40  ;;  %v4393_v8 = vpop.f32.mrb[78].mxu1 }
 0x23a   : > { %v2987_v9 = vpop.f32.mrb[79].mxu1 }
 0x23c   : > { %4354 = vmatmul.mubr.msk.f32.gmra.mrb[14].mxu0 %vm1263_vm1, %v4323_v54 }
 0x23d   : > { %4402 = vmatprep.mubr.msk.f32.mxu0 %vm1263_vm1, %v2917_v58 }
 0x240   : > { %4403 = vmatmul.mubr.msk.f32.vlgmr.msra.gmra.mrb[0].mxu0 %vm1263_vm1, %v4372_v57 }
 0x241   : > { %4405 = vmatprep.mubr.msk.f32.mxu0 %vm1263_vm1, %v2927_v61  ;;  %4563 = vmatpush3.bf16.msra.mxu0 %v4562_v12 }
 0x242   : > { %4564 = vmatprep.subr.bf16.mxu0 %v4711_v13 }
 0x244   : > { %4406 = vmatmul.mubr.msk.f32.gmra.mrb[2].mxu0 %vm1263_vm1, %v4375_v60 }
 0x245   : > { %4408 = vmatprep.mubr.msk.f32.mxu0 %vm1263_vm1, %v2937_v0  ;;  %4566 = vmatpush3.bf16.msra.mxu0 %v4565_v16 }
 0x246   : > { %4567 = vmatprep.subr.bf16.mxu0 %v4711_v13 }
 0x248   : > { %4409 = vmatmul.mubr.msk.f32.gmra.mrb[4].mxu0 %vm1263_vm1, %v4378_v62 }
 0x249   : > { %4411 = vmatprep.mubr.msk.f32.mxu0 %vm1263_vm1, %v2947_v2  ;;  %4569 = vmatpush3.bf16.msra.mxu0 %v4568_v19 }
 0x24a   : > { %4570 = vmatprep.subr.bf16.mxu0 %v4711_v13 }
 0x24c   : > { %4412 = vmatmul.mubr.msk.f32.gmra.mrb[6].mxu0 %vm1263_vm1, %v4381_v1 }
 0x24d   : > { %4414 = vmatprep.mubr.msk.f32.mxu0 %vm1263_vm1, %v2957_v3  ;;  %4572 = vmatpush3.bf16.msra.mxu0 %v4571_v24 }
 0x24e   : > { %4573 = vmatprep.subr.bf16.mxu0 %v4711_v13 }
 0x250   : > { %4415 = vmatmul.mubr.msk.f32.gmra.mrb[8].mxu0 %vm1263_vm1, %v4384_v63 }
 0x251   : > { %4417 = vmatprep.mubr.msk.f32.mxu0 %vm1263_vm1, %v2967_v5  ;;  %4575 = vmatpush3.bf16.msra.mxu0 %v4574_v27 }
 0x252   : > { %4576 = vmatprep.subr.bf16.mxu0 %v4711_v13 }
 0x254   : > { %4418 = vmatmul.mubr.msk.f32.gmra.mrb[10].mxu0 %vm1263_vm1, %v4387_v4 }
 0x255   : > { %4420 = vmatprep.mubr.msk.f32.mxu0 %vm1263_vm1, %v2977_v7  ;;  %4578 = vmatpush3.bf16.msra.mxu0 %v4577_v32 }
 0x256   : > { %4579 = vmatprep.subr.bf16.mxu0 %v4711_v13 }
 0x258   : > { %4421 = vmatmul.mubr.msk.f32.gmra.mrb[12].mxu0 %vm1263_vm1, %v4390_v6 }
 0x259   : > { %4423 = vmatprep.mubr.msk.f32.mxu0 %vm1263_vm1, %v2987_v9  ;;  %4581 = vmatpush3.bf16.msra.mxu0 %v4580_v35 }
 0x25a   : > { %4582 = vmatprep.subr.bf16.mxu0 %v4711_v13 }
 0x25c   : > { %4424 = vmatmul.mubr.msk.f32.gmra.mrb[14].mxu0 %vm1263_vm1, %v4393_v8 }
 0x25d   : > { %4458 = vmatprep.mubr.msk.f32.mxu0 %vm4712_vm10, %v4710_v36  ;;  %4584 = vmatpush3.bf16.msra.mxu0 %v4583_v39  ;;  %v5610_v36 = vld [vmem:[%s5666_s4] sm:$0xff] }
 0x313   : > { %v4404_v42 = vpop.f32.mrb[0].mxu0 }
 0x314   : > { %v3218_v20 = vadd.f32 %v4404_v42, %v5598_v41  ;;  %v3115_v43 = vpop.f32.mrb[1].mxu0 }
 0x315   : > { %v3217_v45 = vadd.f32 %v5598_v41, %v3115_v43 }
 0x316   : > { %v3234_v31 = vmax.f32 %v3218_v20, 0.0 }
 0x317   : > { %v3233_v22 = vmax.f32 %v3217_v45, 0.0  ;;  %v4407_v46 = vpop.f32.mrb[2].mxu0 }
 0x318   : > { %v3252_v47 = vmul.f32 %v5604_v44, %v3234_v31  ;;  %v3220_v48 = vadd.f32 %v4407_v46, %v5598_v41  ;;  %v3125_v29 = vpop.f32.mrb[3].mxu0 }
 0x319   : > { %v3251_v49 = vmul.f32 %v5610_v36, %v3233_v22  ;;  %v3219_v50 = vadd.f32 %v5598_v41, %v3125_v29 }
 0x31a   : > { %v3236_v51 = vmax.f32 %v3220_v48, 0.0 }
 0x31b   : > { %v3267_v52 = vmax.f32 %v3251_v49, %v3252_v47  ;;  %v3235_v53 = vmax.f32 %v3219_v50, 0.0  ;;  %v4410_v54 = vpop.f32.mrb[4].mxu0 }
 0x31c   : > { %v3254_v40 = vmul.f32 %v5604_v44, %v3236_v51  ;;  %v3222_v55 = vadd.f32 %v4410_v54, %v5598_v41  ;;  %v3135_v56 = vpop.f32.mrb[5].mxu0 }
 0x31d   : > { %v3268_v57 = vrot.slane %v3267_v52, 4  ;;  %v3253_v58 = vmul.f32 %v5610_v36, %v3235_v53  ;;  %v3221_v59 = vadd.f32 %v5598_v41, %v3135_v56 }
 0x31e   : > { %v3238_v60 = vmax.f32 %v3222_v55, 0.0 }
 0x31f   : > { %v3269_v61 = vmax.f32 %v3267_v52, %v3268_v57  ;;  %v3274_v62 = vmax.f32 %v3253_v58, %v3254_v40  ;;  %v3237_v0 = vmax.f32 %v3221_v59, 0.0  ;;  %v4413_v1 = vpop.f32.mrb[6].mxu0 }
 0x320   : > { %v3256_v2 = vmul.f32 %v5604_v44, %v3238_v60  ;;  %v3224_v63 = vadd.f32 %v4413_v1, %v5598_v41  ;;  %v3145_v3 = vpop.f32.mrb[7].mxu0 }
 0x321   : > { %v3270_v4 = vrot.slane %v3269_v61, 2  ;;  %v3275_v5 = vrot.slane %v3274_v62, 4  ;;  %v3255_v6 = vmul.f32 %v5610_v36, %v3237_v0  ;;  %v3223_v7 = vadd.f32 %v5598_v41, %v3145_v3 }
 0x322   : > { %v3240_v8 = vmax.f32 %v3224_v63, 0.0 }
 0x323   : > { %v3271_v9 = vmax.f32 %v3269_v61, %v3270_v4  ;;  %v3276_v10 = vmax.f32 %v3274_v62, %v3275_v5  ;;  %v3281_v11 = vmax.f32 %v3255_v6, %v3256_v2  ;;  %v3239_v12 = vmax.f32 %v3223_v7, 0.0  ;;  %v4416_v13 = vpop.f32.mrb[8].mxu0 }
 0x324   : > { %v3258_v14 = vmul.f32 %v5604_v44, %v3240_v8  ;;  %v3226_v15 = vadd.f32 %v4416_v13, %v5598_v41  ;;  %v3155_v16 = vpop.f32.mrb[9].mxu0 }
 0x325   : > { %v3277_v17 = vrot.slane %v3276_v10, 2  ;;  %v3282_v18 = vrot.slane %v3281_v11, 4  ;;  %v3257_v19 = vmul.f32 %v5610_v36, %v3239_v12  ;;  %v3272_v21 = vrot.slane %v3271_v9, 1 }
 0x326   : > { %v3242_v23 = vmax.f32 %v3226_v15, 0.0  ;;  %v3225_v24 = vadd.f32 %v5598_v41, %v3155_v16 }
 0x327   : > { %v3278_v25 = vmax.f32 %v3276_v10, %v3277_v17  ;;  %v3283_v26 = vmax.f32 %v3281_v11, %v3282_v18  ;;  %v3288_v27 = vmax.f32 %v3257_v19, %v3258_v14  ;;  %v4419_v28 = vpop.f32.mrb[10].mxu0  ;;  %v3273_v42 = vmax.f32 %v3271_v9, %v3272_v21 }
 0x328   : > { %v3260_v30 = vmul.f32 %v5604_v44, %v3242_v23  ;;  %v3241_v32 = vmax.f32 %v3225_v24, 0.0  ;;  %v3228_v33 = vadd.f32 %v4419_v28, %v5598_v41  ;;  %v3165_v34 = vpop.f32.mrb[11].mxu0 }
 0x329   : > { %v3279_v35 = vrot.slane %v3278_v25, 1  ;;  %v3284_v37 = vrot.slane %v3283_v26, 2  ;;  %v3289_v38 = vrot.slane %v3288_v27, 4  ;;  %v3227_v39 = vadd.f32 %v5598_v41, %v3165_v34 }
 0x32a   : > { %v3259_v20 = vmul.f32 %v5610_v36, %v3241_v32  ;;  %v3244_v43 = vmax.f32 %v3228_v33, 0.0 }
 0x32b   : > { %v3280_v45 = vmax.f32 %v3278_v25, %v3279_v35  ;;  %v3285_v31 = vmax.f32 %v3283_v26, %v3284_v37  ;;  %v3290_v22 = vmax.f32 %v3288_v27, %v3289_v38  ;;  %v3243_v46 = vmax.f32 %v3227_v39, 0.0  ;;  %v4422_v47 = vpop.f32.mrb[12].mxu0 }
 0x32c   : > { %v3295_v48 = vmax.f32 %v3259_v20, %v3260_v30  ;;  %v3262_v29 = vmul.f32 %v5604_v44, %v3244_v43  ;;  %v3230_v49 = vadd.f32 %v4422_v47, %v5598_v41  ;;  %v3175_v50 = vpop.f32.mrb[13].mxu0  ;;  %v3839_v43 = vld [vmem:[%s5668_s6] ss:$0 sm:$0xff] }
 0x32d   : > { %v3355_v51 = vsel %vm3354_vm11, %v3280_v45, %v3273_v42  ;;  %v3286_v52 = vrot.slane %v3285_v31, 1  ;;  %v3291_v53 = vrot.slane %v3290_v22, 2  ;;  %v3261_v54 = vmul.f32 %v5610_v36, %v3243_v46 }
 0x32e   : > { %v3296_v40 = vrot.slane %v3295_v48, 4  ;;  %v3246_v55 = vmax.f32 %v3230_v49, 0.0  ;;  %v3229_v56 = vadd.f32 %v5598_v41, %v3175_v50 }
 0x32f   : > { %v3287_v57 = vmax.f32 %v3285_v31, %v3286_v52  ;;  %v3292_v58 = vmax.f32 %v3290_v22, %v3291_v53  ;;  %v3302_v59 = vmax.f32 %v3261_v54, %v3262_v29  ;;  %v4425_v60 = vpop.f32.mrb[14].mxu0 }
 0x330   : > { %v3297_v61 = vmax.f32 %v3295_v48, %v3296_v40  ;;  %v3264_v62 = vmul.f32 %v5604_v44, %v3246_v55  ;;  %v3245_v0 = vmax.f32 %v3229_v56, 0.0  ;;  %v3232_v1 = vadd.f32 %v4425_v60, %v5598_v41  ;;  %v3185_v2 = vpop.f32.mrb[15].mxu0 }
 0x331   : > { %v3357_v63 = vsel %vm3356_vm12, %v3287_v57, %v3355_v51  ;;  %v3293_v3 = vrot.slane %v3292_v58, 1  ;;  %v3303_v4 = vrot.slane %v3302_v59, 4  ;;  %v3231_v5 = vadd.f32 %v5598_v41, %v3185_v2 }
 0x332   : > { %v3298_v6 = vrot.slane %v3297_v61, 2  ;;  %v3263_v7 = vmul.f32 %v5610_v36, %v3245_v0  ;;  %v3248_v8 = vmax.f32 %v3232_v1, 0.0 }
 0x333   : > { %v3294_v9 = vmax.f32 %v3292_v58, %v3293_v3  ;;  %v3304_v10 = vmax.f32 %v3302_v59, %v3303_v4  ;;  %v3247_v11 = vmax.f32 %v3231_v5, 0.0 }
 0x334   : > { %v3299_v12 = vmax.f32 %v3297_v61, %v3298_v6  ;;  %v3309_v13 = vmax.f32 %v3263_v7, %v3264_v62  ;;  %v3266_v14 = vmul.f32 %v5604_v44, %v3248_v8 }
 0x335   : > { %v3305_v15 = vrot.slane %v3304_v10, 2  ;;  %v3265_v16 = vmul.f32 %v5610_v36, %v3247_v11  ;;  %v3359_v17 = vsel %vm3358_vm13, %v3294_v9, %v3357_v63 }
 0x336   : > { %v3300_v18 = vrot.slane %v3299_v12, 1  ;;  %v3310_v19 = vrot.slane %v3309_v13, 4 }
 0x337   : > { %v3306_v21 = vmax.f32 %v3304_v10, %v3305_v15  ;;  %v3316_v41 = vmax.f32 %v3265_v16, %v3266_v14 }
 0x338   : > { %v3301_v23 = vmax.f32 %v3299_v12, %v3300_v18  ;;  %v3311_v24 = vmax.f32 %v3309_v13, %v3310_v19 }
 0x339   : > { %v3307_v25 = vrot.slane %v3306_v21, 1  ;;  %v3317_v26 = vrot.slane %v3316_v41, 4 }
 0x33a   : > { %v3312_v27 = vrot.slane %v3311_v24, 2  ;;  %v3361_v28 = vsel %vm3360_vm14, %v3301_v23, %v3359_v17 }
 0x33b   : > { %v3308_v30 = vmax.f32 %v3306_v21, %v3307_v25  ;;  %v3318_v32 = vmax.f32 %v3316_v41, %v3317_v26 }
 0x33c   : > { %v3313_v33 = vmax.f32 %v3311_v24, %v3312_v27 }
 0x33d   : > { %v3319_v44 = vrot.slane %v3318_v32, 2  ;;  %v3363_v34 = vsel %vm3362_vm15, %v3308_v30, %v3361_v28 }
 0x33e   : > { %v3314_v35 = vrot.slane %v3313_v33, 1 }
 0x33f   : > { %v3320_v36 = vmax.f32 %v3318_v32, %v3319_v44 }
 0x340   : > { %v3315_v37 = vmax.f32 %v3313_v33, %v3314_v35 }
 0x341   : > { %v3321_v38 = vrot.slane %v3320_v36, 1 }
 0x342   : > { %v3365_v39 = vsel %vm3364_vm2, %v3315_v37, %v3363_v34 }
 0x343   : > { %v3322_v42 = vmax.f32 %v3320_v36, %v3321_v38 }
 0x345   : > { %v3367_v20 = vsel %vm3366_vm3, %v3322_v42, %v3365_v39 }
 0x346   : > { %4459 = vmatmul.mubr.f32.vlgmr.msra.gmra.mrb[16].mxu0 %v3367_v20 }
 0x419   : > { %v3435_v45 = vpop.f32.mrb[16].mxu0 }
 0x41a   : > { %v3436_v31 = vadd.f32 %v3839_v43, %v3435_v45  ;;  %v4460_v22 = vpop.f32.mrb[17].mxu0 }
 0x41c   : > { %v3840_v46 = vmul.f32 -1.442695, %v3436_v31 }
 0x41e   : > { %4681 = vpow2.f32 %v3840_v46 }
 0x428   : > { %v4682_v47 = vpop.eup %4681 }
 0x429   : > { %v3442_v48 = vadd.f32 1.0, %v4682_v47 }
 0x42b   : > { %4683 = vrcp.f32 %v3442_v48 }
 0x435   : > { %v4684_v29 = vpop.eup %4683 }
 0x436   : > { %3445 = vst [vmem:[%s628_s30] sm:$0xff] %v4684_v29 }
 0x437 PF: > { %p14_p9 = scmp.ge.s32.totalorder %s4770_s28, 4   ;;  %s5670_s24 = smov %s4703_s25 }
 0x438   : > { %s5671_s25 = smov %s4779_s8  ;;  %s5672_s26 = smov %s4770_s28 }
 0x439   :  { %16 = sbr.rel (!%p14_p9) target bundleno = 2 (0x2), region = 129 }

</bundles_post_ra>
